<compile_context>
chip_gen: v5e
topology: v5e:2x2
jax: 0.10.0
libtpu: 0.0.40
codegen_flags: <defaults>
</compile_context>

<pallas_src>
import jax
import jax.numpy as jnp
import numpy as np
from jax.experimental import pallas as pl
from jax.experimental.pallas import tpu as pltpu


# ----------------------------------------------------------------------------
# Pallas kernel: one bidirectional LSTM layer (both directions, full sequence)
# ----------------------------------------------------------------------------
def _bilstm_layer_kernel(x_ref, wih_ref, whh_ref, b_ref, out_ref,
                         gates_scr, h_scr, c_scr):
    TB, D = x_ref.shape
    B, H = h_scr.shape
    T = TB // B
    x = x_ref[...]                                       # (T*B, D), resident

    for d in range(2):                                   # 0 = fwd, 1 = bwd (static)
        # Input projection for ALL timesteps at once; bias folded in here so
        # the recurrent step has a single add.
        gates_scr[...] = (jnp.dot(x, wih_ref[d],
                                  preferred_element_type=jnp.float32)
                          + b_ref[d])                    # (T*B, 4H)
        h_scr[...] = jnp.zeros_like(h_scr)
        c_scr[...] = jnp.zeros_like(c_scr)
        whh = whh_ref[d]                                 # (H, 4H), kept resident
        col0 = d * H                                     # output lane offset

        def step(s, carry, _d=d, _whh=whh, _col0=col0):
            t = s + _d * (T - 1 - 2 * s)                 # fwd: s ; bwd: T-1-s
            row = pl.multiple_of(t * B, B)
            gates = gates_scr[pl.ds(row, B), :] + jnp.dot(
                h_scr[...], _whh, preferred_element_type=jnp.float32)
            sig = jax.nn.sigmoid(gates)                  # full-vreg EUP ops
            tan = jnp.tanh(gates)
            i = sig[:, 0 * H:1 * H]                      # PyTorch gate order i,f,g,o
            f = sig[:, 1 * H:2 * H]
            g = tan[:, 2 * H:3 * H]
            o = sig[:, 3 * H:4 * H]
            c = f * c_scr[...] + i * g
            h = o * jnp.tanh(c)
            c_scr[...] = c
            h_scr[...] = h
            out_ref[pl.ds(row, B), _col0:_col0 + H] = h
            return carry

        jax.lax.fori_loop(0, T, step, 0, unroll=True)


def bilstm_layer(x2d, batch, wih_s, whh_s, b_s):
    """x2d: (T*B, D) f32.  wih_s: (2, D, 4H), whh_s: (2, H, 4H), b_s: (2, 1, 4H)."""
    TB, D = x2d.shape
    H = whh_s.shape[1]
    return pl.pallas_call(
        _bilstm_layer_kernel,
        out_shape=jax.ShapeDtypeStruct((TB, 2 * H), jnp.float32),
        grid=(1,),
        in_specs=[
            pl.BlockSpec((TB, D), lambda i: (0, 0)),
            pl.BlockSpec((2, D, 4 * H), lambda i: (0, 0, 0)),
            pl.BlockSpec((2, H, 4 * H), lambda i: (0, 0, 0)),
            pl.BlockSpec((2, 1, 4 * H), lambda i: (0, 0, 0)),
        ],
        out_specs=pl.BlockSpec((TB, 2 * H), lambda i: (0, 0)),
        scratch_shapes=[
            pltpu.VMEM((TB, 4 * H), jnp.float32),   # precomputed input gates
            pltpu.VMEM((batch, H), jnp.float32),    # h state
            pltpu.VMEM((batch, H), jnp.float32),    # c state
        ],
        compiler_params=pltpu.CompilerParams(
            dimension_semantics=("arbitrary",)),
    )(x2d, wih_s, whh_s, b_s)


# ----------------------------------------------------------------------------
# Pallas kernel: final Linear (fc) with lane-dense (128-padded) output
# ----------------------------------------------------------------------------
def _linear_kernel(x_ref, w_ref, b_ref, o_ref):
    o_ref[...] = (jnp.dot(x_ref[...], w_ref[...],
                          preferred_element_type=jnp.float32) + b_ref[...])


def linear(x2d, w_t_pad, b_pad):
    M, D = x2d.shape
    Cp = w_t_pad.shape[1]
    return pl.pallas_call(
        _linear_kernel,
        out_shape=jax.ShapeDtypeStruct((M, Cp), jnp.float32),
        grid=(1,),
        in_specs=[pl.BlockSpec((M, D), lambda i: (0, 0)),
                  pl.BlockSpec((D, Cp), lambda i: (0, 0)),
                  pl.BlockSpec((1, Cp), lambda i: (0, 0))],
        out_specs=pl.BlockSpec((M, Cp), lambda i: (0, 0)),
    )(x2d, w_t_pad, b_pad)


# ----------------------------------------------------------------------------
# Parameter init (mimics PyTorch nn.LSTM / nn.Linear default uniform init)
# ----------------------------------------------------------------------------
def init_lstm_params(key, input_size, hidden_size, num_layers):
    k = 1.0 / np.sqrt(hidden_size)
    layers = []
    for l in range(num_layers):
        d_in = input_size if l == 0 else 2 * hidden_size
        wih_l, whh_l, b_l = [], [], []
        for _ in range(2):                               # fwd, bwd
            key, k1, k2, k3, k4 = jax.random.split(key, 5)
            wih = jax.random.uniform(k1, (4 * hidden_size, d_in), jnp.float32, -k, k)
            whh = jax.random.uniform(k2, (4 * hidden_size, hidden_size), jnp.float32, -k, k)
            bih = jax.random.uniform(k3, (4 * hidden_size,), jnp.float32, -k, k)
            bhh = jax.random.uniform(k4, (4 * hidden_size,), jnp.float32, -k, k)
            wih_l.append(wih.T)                          # (d_in, 4H)
            whh_l.append(whh.T)                          # (H, 4H)
            b_l.append((bih + bhh).reshape(1, -1))       # fused bias (1, 4H)
        layers.append((jnp.stack(wih_l), jnp.stack(whh_l), jnp.stack(b_l)))
    return key, layers


def init_decoder_params(seed, in_channels, n_class, hidden_size, num_layers):
    key = jax.random.PRNGKey(seed)
    key, rnn1 = init_lstm_params(key, in_channels, hidden_size, num_layers)
    key, rnn2 = init_lstm_params(key, 2 * hidden_size, hidden_size, num_layers)
    kf = 1.0 / np.sqrt(2 * hidden_size)
    key, kw, kb = jax.random.split(key, 3)
    fc_w = jax.random.uniform(kw, (n_class, 2 * hidden_size), jnp.float32, -kf, kf)
    fc_b = jax.random.uniform(kb, (n_class,), jnp.float32, -kf, kf)
    # lane-dense (multiple-of-128) padded FC weights for the kernel
    c_pad = ((n_class + 127) // 128) * 128
    fc_w_t_pad = jnp.zeros((2 * hidden_size, c_pad), jnp.float32).at[:, :n_class].set(fc_w.T)
    fc_b_pad = jnp.zeros((1, c_pad), jnp.float32).at[:, :n_class].set(fc_b)
    return {"rnn1": rnn1, "rnn2": rnn2, "fc_w": fc_w, "fc_b": fc_b,
            "fc_w_t_pad": fc_w_t_pad, "fc_b_pad": fc_b_pad}


# ----------------------------------------------------------------------------
# Decoder forward (glue in XLA, hot path in Pallas)
# ----------------------------------------------------------------------------
def decoder_forward(x_nchw, params, n_class):
    x = jnp.squeeze(x_nchw, axis=2)          # (N, C, W)
    x = jnp.transpose(x, (2, 0, 1))          # (T=W, B=N, D=C)
    T, B, C = x.shape
    B_pad = ((B + 7) // 8) * 8               # pad batch to 8-sublane multiple
    if B_pad != B:
        x = jnp.pad(x, ((0, 0), (0, B_pad - B), (0, 0)))
    h = x.reshape(T * B_pad, C)              # time-major, flattened (T*B, D)
    for layer in params["rnn1"]:
        h = bilstm_layer(h, B_pad, *layer)
    for layer in params["rnn2"]:
        h = bilstm_layer(h, B_pad, *layer)
    # TODO(synk): original module does `print(x.shape)` here; omitted to keep stdout clean.
    y = linear(h, params["fc_w_t_pad"], params["fc_b_pad"])   # (T*B_pad, C_pad)
    Cp = y.shape[1]
    y = y.reshape(T, B_pad, Cp)[:, :B, :n_class]
    return y                                  # (T, B, n_class)


# ----------------------------------------------------------------------------
# Pure-JAX reference (correctness check of the Pallas kernels)
# ----------------------------------------------------------------------------
def _ref_lstm_dir(x, wih_t, whh_t, bias):
    T, B, D = x.shape
    H = whh_t.shape[0]

    def step(carry, x_t):
        h, c = carry
        gates = x_t @ wih_t + h @ whh_t + bias
        i = jax.nn.sigmoid(gates[:, :H])
        f = jax.nn.sigmoid(gates[:, H:2 * H])
        g = jnp.tanh(gates[:, 2 * H:3 * H])
        o = jax.nn.sigmoid(gates[:, 3 * H:])
        c = f * c + i * g
        h = o * jnp.tanh(c)
        return (h, c), h

    init = (jnp.zeros((B, H), jnp.float32), jnp.zeros((B, H), jnp.float32))
    _, hs = jax.lax.scan(step, init, x)
    return hs


def _ref_bilstm(x, layers):
    out = x
    for (wih_s, whh_s, b_s) in layers:
        fwd = _ref_lstm_dir(out, wih_s[0], whh_s[0], b_s[0])
        bwd = jnp.flip(_ref_lstm_dir(jnp.flip(out, 0), wih_s[1], whh_s[1], b_s[1]), 0)
        out = jnp.concatenate([fwd, bwd], axis=-1)
    return out


def _ref_decoder(x_nchw, params):
    x = jnp.transpose(jnp.squeeze(x_nchw, axis=2), (2, 0, 1))
    x = _ref_bilstm(x, params["rnn1"])
    x = _ref_bilstm(x, params["rnn2"])
    return x @ params["fc_w"].T + params["fc_b"]


# ----------------------------------------------------------------------------
if __name__ == "__main__":
    # small shapes: N=2, C=in_channels=16, H=1, W=seq=8; hidden=32, layers=2, classes=10
    N, C, W = 2, 16, 8
    hidden_size, num_layers, n_class = 32, 2, 10

    x = jax.random.normal(jax.random.PRNGKey(0), (N, C, 1, W), dtype=jnp.float32)
    params = init_decoder_params(1, C, n_class, hidden_size, num_layers)

    out = decoder_forward(x, params, n_class)
    out = jax.block_until_ready(out)
    assert out.shape == (W, N, n_class), out.shape

    ref = jax.block_until_ready(_ref_decoder(x, params))
    np.testing.assert_allclose(np.asarray(out), np.asarray(ref), atol=1e-4, rtol=1e-4)

    print("KERNEL_OK")
</pallas_src>

<mosaic_0001>
module attributes {stable_mosaic.version = 11 : i64} {
  func.func @_bilstm_layer_kernel(%arg0: i32, %arg1: memref<64x16xf32, #tpu.memory_space<vmem>>, %arg2: memref<2x16x128xf32, #tpu.memory_space<vmem>>, %arg3: memref<2x32x128xf32, #tpu.memory_space<vmem>>, %arg4: memref<2x1x128xf32, #tpu.memory_space<vmem>>, %arg5: memref<64x64xf32, #tpu.memory_space<vmem>>, %arg6: memref<64x128xf32, #tpu.memory_space<vmem>>, %arg7: memref<8x32xf32, #tpu.memory_space<vmem>>, %arg8: memref<8x32xf32, #tpu.memory_space<vmem>>) attributes {dimension_semantics = [#tpu.dimension_semantics<arbitrary>], iteration_bounds = array<i64: 1>, scalar_prefetch = 0 : i64, scratch_operands = 3 : i64, tpu.core_type = #tpu.core_type<tc>, window_params = [{pipeline_mode = #tpu.pipeline_mode<synchronous>, transform_indices = @transform_0, window_bounds = array<i64: 64, 16>}, {pipeline_mode = #tpu.pipeline_mode<synchronous>, transform_indices = @transform_1, window_bounds = array<i64: 2, 16, 128>}, {pipeline_mode = #tpu.pipeline_mode<synchronous>, transform_indices = @transform_2, window_bounds = array<i64: 2, 32, 128>}, {pipeline_mode = #tpu.pipeline_mode<synchronous>, transform_indices = @transform_3, window_bounds = array<i64: 2, 1, 128>}, {pipeline_mode = #tpu.pipeline_mode<synchronous>, transform_indices = @transform_4, window_bounds = array<i64: 64, 64>}]} {
    %c0 = arith.constant 0 : index
    %c0_0 = arith.constant 0 : index
    %0 = vector.load %arg1[%c0, %c0_0] : memref<64x16xf32, #tpu.memory_space<vmem>>, vector<64x16xf32>
    %c0_1 = arith.constant 0 : index
    %c0_2 = arith.constant 0 : index
    %c0_3 = arith.constant 0 : index
    %1 = vector.load %arg2[%c0_1, %c0_2, %c0_3] : memref<2x16x128xf32, #tpu.memory_space<vmem>>, vector<1x16x128xf32>
    %2 = vector.shape_cast %1 : vector<1x16x128xf32> to vector<16x128xf32>
    %cst = arith.constant dense<0.000000e+00> : vector<64x128xf32>
    %3 = tpu.matmul %0, %2, %cst {dimension_numbers = #tpu.dot_dimension_numbers<[1], [0], [0], [1], [0, 0, 1, 1], [], []>} : vector<64x16xf32>, vector<16x128xf32>, vector<64x128xf32> -> vector<64x128xf32>
    %c0_4 = arith.constant 0 : index
    %c0_5 = arith.constant 0 : index
    %c0_6 = arith.constant 0 : index
    %4 = vector.load %arg4[%c0_4, %c0_5, %c0_6] : memref<2x1x128xf32, #tpu.memory_space<vmem>>, vector<1x1x128xf32>
    %5 = vector.shape_cast %4 : vector<1x1x128xf32> to vector<1x128xf32>
    %6 = vector.broadcast %5 : vector<1x128xf32> to vector<64x128xf32>
    %7 = arith.addf %3, %6 : vector<64x128xf32>
    %c0_7 = arith.constant 0 : index
    %c0_8 = arith.constant 0 : index
    %8 = vector.load %arg6[%c0_7, %c0_8] : memref<64x128xf32, #tpu.memory_space<vmem>>, vector<64x128xf32>
    tpu.vector_store %arg6[%c0_7, %c0_8], %7 {strides = array<i32>} : memref<64x128xf32, #tpu.memory_space<vmem>>, vector<64x128xf32>,
    %cst_9 = arith.constant 0.000000e+00 : f32
    %9 = vector.broadcast %cst_9 : f32 to vector<8x32xf32>
    %c0_10 = arith.constant 0 : index
    %c0_11 = arith.constant 0 : index
    %10 = vector.load %arg7[%c0_10, %c0_11] : memref<8x32xf32, #tpu.memory_space<vmem>>, vector<8x32xf32>
    tpu.vector_store %arg7[%c0_10, %c0_11], %9 {strides = array<i32>} : memref<8x32xf32, #tpu.memory_space<vmem>>, vector<8x32xf32>,
    %cst_12 = arith.constant 0.000000e+00 : f32
    %11 = vector.broadcast %cst_12 : f32 to vector<8x32xf32>
    %c0_13 = arith.constant 0 : index
    %c0_14 = arith.constant 0 : index
    %12 = vector.load %arg8[%c0_13, %c0_14] : memref<8x32xf32, #tpu.memory_space<vmem>>, vector<8x32xf32>
    tpu.vector_store %arg8[%c0_13, %c0_14], %11 {strides = array<i32>} : memref<8x32xf32, #tpu.memory_space<vmem>>, vector<8x32xf32>,
    %c0_15 = arith.constant 0 : index
    %c0_16 = arith.constant 0 : index
    %c0_17 = arith.constant 0 : index
    %13 = vector.load %arg3[%c0_15, %c0_16, %c0_17] : memref<2x32x128xf32, #tpu.memory_space<vmem>>, vector<1x32x128xf32>
    %14 = vector.shape_cast %13 : vector<1x32x128xf32> to vector<32x128xf32>
    %c0_i32 = arith.constant 0 : i32
    %c2_i32 = arith.constant 2 : i32
    %15 = arith.muli %c2_i32, %c0_i32 : i32
    %c7_i32 = arith.constant 7 : i32
    %16 = arith.subi %c7_i32, %15 : i32
    %c0_i32_18 = arith.constant 0 : i32
    %17 = arith.muli %c0_i32_18, %16 : i32
    %18 = arith.addi %c0_i32, %17 : i32
    %c8_i32 = arith.constant 8 : i32
    %19 = arith.muli %18, %c8_i32 : i32
    %20 = tpu.assume_multiple %19, 8 : i32
    %21 = arith.index_cast %20 : i32 to index
    %c0_19 = arith.constant 0 : index
    %22 = vector.load %arg6[%21, %c0_19] : memref<64x128xf32, #tpu.memory_space<vmem>>, vector<8x128xf32>
    %c0_20 = arith.constant 0 : index
    %c0_21 = arith.constant 0 : index
    %23 = vector.load %arg7[%c0_20, %c0_21] : memref<8x32xf32, #tpu.memory_space<vmem>>, vector<8x32xf32>
    %cst_22 = arith.constant dense<0.000000e+00> : vector<8x128xf32>
    %24 = tpu.matmul %23, %14, %cst_22 {dimension_numbers = #tpu.dot_dimension_numbers<[1], [0], [0], [1], [0, 0, 1, 1], [], []>} : vector<8x32xf32>, vector<32x128xf32>, vector<8x128xf32> -> vector<8x128xf32>
    %25 = arith.addf %22, %24 : vector<8x128xf32>
    %26 = arith.negf %25 : vector<8x128xf32>
    %27 = math.exp %26 : vector<8x128xf32>
    %cst_23 = arith.constant 1.000000e+00 : f32
    %28 = vector.broadcast %cst_23 : f32 to vector<8x128xf32>
    %29 = arith.addf %28, %27 : vector<8x128xf32>
    %30 = arith.divf %28, %29 : vector<8x128xf32>
    %31 = math.tanh %25 : vector<8x128xf32>
    %32 = vector.extract_strided_slice %30 {offsets = [0, 0], sizes = [8, 32], strides = [1, 1]} : vector<8x128xf32> to vector<8x32xf32>
    %33 = vector.extract_strided_slice %30 {offsets = [0, 32], sizes = [8, 32], strides = [1, 1]} : vector<8x128xf32> to vector<8x32xf32>
    %34 = vector.extract_strided_slice %31 {offsets = [0, 64], sizes = [8, 32], strides = [1, 1]} : vector<8x128xf32> to vector<8x32xf32>
    %35 = vector.extract_strided_slice %30 {offsets = [0, 96], sizes = [8, 32], strides = [1, 1]} : vector<8x128xf32> to vector<8x32xf32>
    %c0_24 = arith.constant 0 : index
    %c0_25 = arith.constant 0 : index
    %36 = vector.load %arg8[%c0_24, %c0_25] : memref<8x32xf32, #tpu.memory_space<vmem>>, vector<8x32xf32>
    %37 = arith.mulf %33, %36 : vector<8x32xf32>
    %38 = arith.mulf %32, %34 : vector<8x32xf32>
    %39 = arith.addf %37, %38 : vector<8x32xf32>
    %40 = math.tanh %39 : vector<8x32xf32>
    %41 = arith.mulf %35, %40 : vector<8x32xf32>
    %c0_26 = arith.constant 0 : index
    %c0_27 = arith.constant 0 : index
    %42 = vector.load %arg8[%c0_26, %c0_27] : memref<8x32xf32, #tpu.memory_space<vmem>>, vector<8x32xf32>
    tpu.vector_store %arg8[%c0_26, %c0_27], %39 {strides = array<i32>} : memref<8x32xf32, #tpu.memory_space<vmem>>, vector<8x32xf32>,
    %c0_28 = arith.constant 0 : index
    %c0_29 = arith.constant 0 : index
    %43 = vector.load %arg7[%c0_28, %c0_29] : memref<8x32xf32, #tpu.memory_space<vmem>>, vector<8x32xf32>
    tpu.vector_store %arg7[%c0_28, %c0_29], %41 {strides = array<i32>} : memref<8x32xf32, #tpu.memory_space<vmem>>, vector<8x32xf32>,
    %44 = arith.index_cast %20 : i32 to index
    %c0_30 = arith.constant 0 : index
    %45 = vector.load %arg5[%44, %c0_30] : memref<64x64xf32, #tpu.memory_space<vmem>>, vector<8x32xf32>
    tpu.vector_store %arg5[%44, %c0_30], %41 {strides = array<i32>} : memref<64x64xf32, #tpu.memory_space<vmem>>, vector<8x32xf32>,
    %c1_i32 = arith.constant 1 : i32
    %c2_i32_31 = arith.constant 2 : i32
    %46 = arith.muli %c2_i32_31, %c1_i32 : i32
    %c7_i32_32 = arith.constant 7 : i32
    %47 = arith.subi %c7_i32_32, %46 : i32
    %c0_i32_33 = arith.constant 0 : i32
    %48 = arith.muli %c0_i32_33, %47 : i32
    %49 = arith.addi %c1_i32, %48 : i32
    %c8_i32_34 = arith.constant 8 : i32
    %50 = arith.muli %49, %c8_i32_34 : i32
    %51 = tpu.assume_multiple %50, 8 : i32
    %52 = arith.index_cast %51 : i32 to index
    %c0_35 = arith.constant 0 : index
    %53 = vector.load %arg6[%52, %c0_35] : memref<64x128xf32, #tpu.memory_space<vmem>>, vector<8x128xf32>
    %c0_36 = arith.constant 0 : index
    %c0_37 = arith.constant 0 : index
    %54 = vector.load %arg7[%c0_36, %c0_37] : memref<8x32xf32, #tpu.memory_space<vmem>>, vector<8x32xf32>
    %cst_38 = arith.constant dense<0.000000e+00> : vector<8x128xf32>
    %55 = tpu.matmul %54, %14, %cst_38 {dimension_numbers = #tpu.dot_dimension_numbers<[1], [0], [0], [1], [0, 0, 1, 1], [], []>} : vector<8x32xf32>, vector<32x128xf32>, vector<8x128xf32> -> vector<8x128xf32>
    %56 = arith.addf %53, %55 : vector<8x128xf32>
    %57 = arith.negf %56 : vector<8x128xf32>
    %58 = math.exp %57 : vector<8x128xf32>
    %cst_39 = arith.constant 1.000000e+00 : f32
    %59 = vector.broadcast %cst_39 : f32 to vector<8x128xf32>
    %60 = arith.addf %59, %58 : vector<8x128xf32>
    %61 = arith.divf %59, %60 : vector<8x128xf32>
    %62 = math.tanh %56 : vector<8x128xf32>
    %63 = vector.extract_strided_slice %61 {offsets = [0, 0], sizes = [8, 32], strides = [1, 1]} : vector<8x128xf32> to vector<8x32xf32>
    %64 = vector.extract_strided_slice %61 {offsets = [0, 32], sizes = [8, 32], strides = [1, 1]} : vector<8x128xf32> to vector<8x32xf32>
    %65 = vector.extract_strided_slice %62 {offsets = [0, 64], sizes = [8, 32], strides = [1, 1]} : vector<8x128xf32> to vector<8x32xf32>
    %66 = vector.extract_strided_slice %61 {offsets = [0, 96], sizes = [8, 32], strides = [1, 1]} : vector<8x128xf32> to vector<8x32xf32>
    %c0_40 = arith.constant 0 : index
    %c0_41 = arith.constant 0 : index
    %67 = vector.load %arg8[%c0_40, %c0_41] : memref<8x32xf32, #tpu.memory_space<vmem>>, vector<8x32xf32>
    %68 = arith.mulf %64, %67 : vector<8x32xf32>
    %69 = arith.mulf %63, %65 : vector<8x32xf32>
    %70 = arith.addf %68, %69 : vector<8x32xf32>
    %71 = math.tanh %70 : vector<8x32xf32>
    %72 = arith.mulf %66, %71 : vector<8x32xf32>
    %c0_42 = arith.constant 0 : index
    %c0_43 = arith.constant 0 : index
    %73 = vector.load %arg8[%c0_42, %c0_43] : memref<8x32xf32, #tpu.memory_space<vmem>>, vector<8x32xf32>
    tpu.vector_store %arg8[%c0_42, %c0_43], %70 {strides = array<i32>} : memref<8x32xf32, #tpu.memory_space<vmem>>, vector<8x32xf32>,
    %c0_44 = arith.constant 0 : index
    %c0_45 = arith.constant 0 : index
    %74 = vector.load %arg7[%c0_44, %c0_45] : memref<8x32xf32, #tpu.memory_space<vmem>>, vector<8x32xf32>
    tpu.vector_store %arg7[%c0_44, %c0_45], %72 {strides = array<i32>} : memref<8x32xf32, #tpu.memory_space<vmem>>, vector<8x32xf32>,
    %75 = arith.index_cast %51 : i32 to index
    %c0_46 = arith.constant 0 : index
    %76 = vector.load %arg5[%75, %c0_46] : memref<64x64xf32, #tpu.memory_space<vmem>>, vector<8x32xf32>
    tpu.vector_store %arg5[%75, %c0_46], %72 {strides = array<i32>} : memref<64x64xf32, #tpu.memory_space<vmem>>, vector<8x32xf32>,
    %c2_i32_47 = arith.constant 2 : i32
    %c2_i32_48 = arith.constant 2 : i32
    %77 = arith.muli %c2_i32_48, %c2_i32_47 : i32
    %c7_i32_49 = arith.constant 7 : i32
    %78 = arith.subi %c7_i32_49, %77 : i32
    %c0_i32_50 = arith.constant 0 : i32
    %79 = arith.muli %c0_i32_50, %78 : i32
    %80 = arith.addi %c2_i32_47, %79 : i32
    %c8_i32_51 = arith.constant 8 : i32
    %81 = arith.muli %80, %c8_i32_51 : i32
    %82 = tpu.assume_multiple %81, 8 : i32
    %83 = arith.index_cast %82 : i32 to index
    %c0_52 = arith.constant 0 : index
    %84 = vector.load %arg6[%83, %c0_52] : memref<64x128xf32, #tpu.memory_space<vmem>>, vector<8x128xf32>
    %c0_53 = arith.constant 0 : index
    %c0_54 = arith.constant 0 : index
    %85 = vector.load %arg7[%c0_53, %c0_54] : memref<8x32xf32, #tpu.memory_space<vmem>>, vector<8x32xf32>
    %cst_55 = arith.constant dense<0.000000e+00> : vector<8x128xf32>
    %86 = tpu.matmul %85, %14, %cst_55 {dimension_numbers = #tpu.dot_dimension_numbers<[1], [0], [0], [1], [0, 0, 1, 1], [], []>} : vector<8x32xf32>, vector<32x128xf32>, vector<8x128xf32> -> vector<8x128xf32>
    %87 = arith.addf %84, %86 : vector<8x128xf32>
    %88 = arith.negf %87 : vector<8x128xf32>
    %89 = math.exp %88 : vector<8x128xf32>
    %cst_56 = arith.constant 1.000000e+00 : f32
    %90 = vector.broadcast %cst_56 : f32 to vector<8x128xf32>
    %91 = arith.addf %90, %89 : vector<8x128xf32>
    %92 = arith.divf %90, %91 : vector<8x128xf32>
    %93 = math.tanh %87 : vector<8x128xf32>
    %94 = vector.extract_strided_slice %92 {offsets = [0, 0], sizes = [8, 32], strides = [1, 1]} : vector<8x128xf32> to vector<8x32xf32>
    %95 = vector.extract_strided_slice %92 {offsets = [0, 32], sizes = [8, 32], strides = [1, 1]} : vector<8x128xf32> to vector<8x32xf32>
    %96 = vector.extract_strided_slice %93 {offsets = [0, 64], sizes = [8, 32], strides = [1, 1]} : vector<8x128xf32> to vector<8x32xf32>
    %97 = vector.extract_strided_slice %92 {offsets = [0, 96], sizes = [8, 32], strides = [1, 1]} : vector<8x128xf32> to vector<8x32xf32>
    %c0_57 = arith.constant 0 : index
    %c0_58 = arith.constant 0 : index
    %98 = vector.load %arg8[%c0_57, %c0_58] : memref<8x32xf32, #tpu.memory_space<vmem>>, vector<8x32xf32>
    %99 = arith.mulf %95, %98 : vector<8x32xf32>
    %100 = arith.mulf %94, %96 : vector<8x32xf32>
    %101 = arith.addf %99, %100 : vector<8x32xf32>
    %102 = math.tanh %101 : vector<8x32xf32>
    %103 = arith.mulf %97, %102 : vector<8x32xf32>
    %c0_59 = arith.constant 0 : index
    %c0_60 = arith.constant 0 : index
    %104 = vector.load %arg8[%c0_59, %c0_60] : memref<8x32xf32, #tpu.memory_space<vmem>>, vector<8x32xf32>
    tpu.vector_store %arg8[%c0_59, %c0_60], %101 {strides = array<i32>} : memref<8x32xf32, #tpu.memory_space<vmem>>, vector<8x32xf32>,
    %c0_61 = arith.constant 0 : index
    %c0_62 = arith.constant 0 : index
    %105 = vector.load %arg7[%c0_61, %c0_62] : memref<8x32xf32, #tpu.memory_space<vmem>>, vector<8x32xf32>
    tpu.vector_store %arg7[%c0_61, %c0_62], %103 {strides = array<i32>} : memref<8x32xf32, #tpu.memory_space<vmem>>, vector<8x32xf32>,
    %106 = arith.index_cast %82 : i32 to index
    %c0_63 = arith.constant 0 : index
    %107 = vector.load %arg5[%106, %c0_63] : memref<64x64xf32, #tpu.memory_space<vmem>>, vector<8x32xf32>
    tpu.vector_store %arg5[%106, %c0_63], %103 {strides = array<i32>} : memref<64x64xf32, #tpu.memory_space<vmem>>, vector<8x32xf32>,
    %c3_i32 = arith.constant 3 : i32
    %c2_i32_64 = arith.constant 2 : i32
    %108 = arith.muli %c2_i32_64, %c3_i32 : i32
    %c7_i32_65 = arith.constant 7 : i32
    %109 = arith.subi %c7_i32_65, %108 : i32
    %c0_i32_66 = arith.constant 0 : i32
    %110 = arith.muli %c0_i32_66, %109 : i32
    %111 = arith.addi %c3_i32, %110 : i32
    %c8_i32_67 = arith.constant 8 : i32
    %112 = arith.muli %111, %c8_i32_67 : i32
    %113 = tpu.assume_multiple %112, 8 : i32
    %114 = arith.index_cast %113 : i32 to index
    %c0_68 = arith.constant 0 : index
    %115 = vector.load %arg6[%114, %c0_68] : memref<64x128xf32, #tpu.memory_space<vmem>>, vector<8x128xf32>
    %c0_69 = arith.constant 0 : index
    %c0_70 = arith.constant 0 : index
    %116 = vector.load %arg7[%c0_69, %c0_70] : memref<8x32xf32, #tpu.memory_space<vmem>>, vector<8x32xf32>
    %cst_71 = arith.constant dense<0.000000e+00> : vector<8x128xf32>
    %117 = tpu.matmul %116, %14, %cst_71 {dimension_numbers = #tpu.dot_dimension_numbers<[1], [0], [0], [1], [0, 0, 1, 1], [], []>} : vector<8x32xf32>, vector<32x128xf32>, vector<8x128xf32> -> vector<8x128xf32>
    %118 = arith.addf %115, %117 : vector<8x128xf32>
    %119 = arith.negf %118 : vector<8x128xf32>
    %120 = math.exp %119 : vector<8x128xf32>
    %cst_72 = arith.constant 1.000000e+00 : f32
    %121 = vector.broadcast %cst_72 : f32 to vector<8x128xf32>
    %122 = arith.addf %121, %120 : vector<8x128xf32>
    %123 = arith.divf %121, %122 : vector<8x128xf32>
    %124 = math.tanh %118 : vector<8x128xf32>
    %125 = vector.extract_strided_slice %123 {offsets = [0, 0], sizes = [8, 32], strides = [1, 1]} : vector<8x128xf32> to vector<8x32xf32>
    %126 = vector.extract_strided_slice %123 {offsets = [0, 32], sizes = [8, 32], strides = [1, 1]} : vector<8x128xf32> to vector<8x32xf32>
    %127 = vector.extract_strided_slice %124 {offsets = [0, 64], sizes = [8, 32], strides = [1, 1]} : vector<8x128xf32> to vector<8x32xf32>
    %128 = vector.extract_strided_slice %123 {offsets = [0, 96], sizes = [8, 32], strides = [1, 1]} : vector<8x128xf32> to vector<8x32xf32>
    %c0_73 = arith.constant 0 : index
    %c0_74 = arith.constant 0 : index
    %129 = vector.load %arg8[%c0_73, %c0_74] : memref<8x32xf32, #tpu.memory_space<vmem>>, vector<8x32xf32>
    %130 = arith.mulf %126, %129 : vector<8x32xf32>
    %131 = arith.mulf %125, %127 : vector<8x32xf32>
    %132 = arith.addf %130, %131 : vector<8x32xf32>
    %133 = math.tanh %132 : vector<8x32xf32>
    %134 = arith.mulf %128, %133 : vector<8x32xf32>
    %c0_75 = arith.constant 0 : index
    %c0_76 = arith.constant 0 : index
    %135 = vector.load %arg8[%c0_75, %c0_76] : memref<8x32xf32, #tpu.memory_space<vmem>>, vector<8x32xf32>
    tpu.vector_store %arg8[%c0_75, %c0_76], %132 {strides = array<i32>} : memref<8x32xf32, #tpu.memory_space<vmem>>, vector<8x32xf32>,
    %c0_77 = arith.constant 0 : index
    %c0_78 = arith.constant 0 : index
    %136 = vector.load %arg7[%c0_77, %c0_78] : memref<8x32xf32, #tpu.memory_space<vmem>>, vector<8x32xf32>
    tpu.vector_store %arg7[%c0_77, %c0_78], %134 {strides = array<i32>} : memref<8x32xf32, #tpu.memory_space<vmem>>, vector<8x32xf32>,
    %137 = arith.index_cast %113 : i32 to index
    %c0_79 = arith.constant 0 : index
    %138 = vector.load %arg5[%137, %c0_79] : memref<64x64xf32, #tpu.memory_space<vmem>>, vector<8x32xf32>
    tpu.vector_store %arg5[%137, %c0_79], %134 {strides = array<i32>} : memref<64x64xf32, #tpu.memory_space<vmem>>, vector<8x32xf32>,
    %c4_i32 = arith.constant 4 : i32
    %c2_i32_80 = arith.constant 2 : i32
    %139 = arith.muli %c2_i32_80, %c4_i32 : i32
    %c7_i32_81 = arith.constant 7 : i32
    %140 = arith.subi %c7_i32_81, %139 : i32
    %c0_i32_82 = arith.constant 0 : i32
    %141 = arith.muli %c0_i32_82, %140 : i32
    %142 = arith.addi %c4_i32, %141 : i32
    %c8_i32_83 = arith.constant 8 : i32
    %143 = arith.muli %142, %c8_i32_83 : i32
    %144 = tpu.assume_multiple %143, 8 : i32
    %145 = arith.index_cast %144 : i32 to index
    %c0_84 = arith.constant 0 : index
    %146 = vector.load %arg6[%145, %c0_84] : memref<64x128xf32, #tpu.memory_space<vmem>>, vector<8x128xf32>
    %c0_85 = arith.constant 0 : index
    %c0_86 = arith.constant 0 : index
    %147 = vector.load %arg7[%c0_85, %c0_86] : memref<8x32xf32, #tpu.memory_space<vmem>>, vector<8x32xf32>
    %cst_87 = arith.constant dense<0.000000e+00> : vector<8x128xf32>
    %148 = tpu.matmul %147, %14, %cst_87 {dimension_numbers = #tpu.dot_dimension_numbers<[1], [0], [0], [1], [0, 0, 1, 1], [], []>} : vector<8x32xf32>, vector<32x128xf32>, vector<8x128xf32> -> vector<8x128xf32>
    %149 = arith.addf %146, %148 : vector<8x128xf32>
    %150 = arith.negf %149 : vector<8x128xf32>
    %151 = math.exp %150 : vector<8x128xf32>
    %cst_88 = arith.constant 1.000000e+00 : f32
    %152 = vector.broadcast %cst_88 : f32 to vector<8x128xf32>
    %153 = arith.addf %152, %151 : vector<8x128xf32>
    %154 = arith.divf %152, %153 : vector<8x128xf32>
    %155 = math.tanh %149 : vector<8x128xf32>
    %156 = vector.extract_strided_slice %154 {offsets = [0, 0], sizes = [8, 32], strides = [1, 1]} : vector<8x128xf32> to vector<8x32xf32>
    %157 = vector.extract_strided_slice %154 {offsets = [0, 32], sizes = [8, 32], strides = [1, 1]} : vector<8x128xf32> to vector<8x32xf32>
    %158 = vector.extract_strided_slice %155 {offsets = [0, 64], sizes = [8, 32], strides = [1, 1]} : vector<8x128xf32> to vector<8x32xf32>
    %159 = vector.extract_strided_slice %154 {offsets = [0, 96], sizes = [8, 32], strides = [1, 1]} : vector<8x128xf32> to vector<8x32xf32>
    %c0_89 = arith.constant 0 : index
    %c0_90 = arith.constant 0 : index
    %160 = vector.load %arg8[%c0_89, %c0_90] : memref<8x32xf32, #tpu.memory_space<vmem>>, vector<8x32xf32>
    %161 = arith.mulf %157, %160 : vector<8x32xf32>
    %162 = arith.mulf %156, %158 : vector<8x32xf32>
    %163 = arith.addf %161, %162 : vector<8x32xf32>
    %164 = math.tanh %163 : vector<8x32xf32>
    %165 = arith.mulf %159, %164 : vector<8x32xf32>
    %c0_91 = arith.constant 0 : index
    %c0_92 = arith.constant 0 : index
    %166 = vector.load %arg8[%c0_91, %c0_92] : memref<8x32xf32, #tpu.memory_space<vmem>>, vector<8x32xf32>
    tpu.vector_store %arg8[%c0_91, %c0_92], %163 {strides = array<i32>} : memref<8x32xf32, #tpu.memory_space<vmem>>, vector<8x32xf32>,
    %c0_93 = arith.constant 0 : index
    %c0_94 = arith.constant 0 : index
    %167 = vector.load %arg7[%c0_93, %c0_94] : memref<8x32xf32, #tpu.memory_space<vmem>>, vector<8x32xf32>
    tpu.vector_store %arg7[%c0_93, %c0_94], %165 {strides = array<i32>} : memref<8x32xf32, #tpu.memory_space<vmem>>, vector<8x32xf32>,
    %168 = arith.index_cast %144 : i32 to index
    %c0_95 = arith.constant 0 : index
    %169 = vector.load %arg5[%168, %c0_95] : memref<64x64xf32, #tpu.memory_space<vmem>>, vector<8x32xf32>
    tpu.vector_store %arg5[%168, %c0_95], %165 {strides = array<i32>} : memref<64x64xf32, #tpu.memory_space<vmem>>, vector<8x32xf32>,
    %c5_i32 = arith.constant 5 : i32
    %c2_i32_96 = arith.constant 2 : i32
    %170 = arith.muli %c2_i32_96, %c5_i32 : i32
    %c7_i32_97 = arith.constant 7 : i32
    %171 = arith.subi %c7_i32_97, %170 : i32
    %c0_i32_98 = arith.constant 0 : i32
    %172 = arith.muli %c0_i32_98, %171 : i32
    %173 = arith.addi %c5_i32, %172 : i32
    %c8_i32_99 = arith.constant 8 : i32
    %174 = arith.muli %173, %c8_i32_99 : i32
    %175 = tpu.assume_multiple %174, 8 : i32
    %176 = arith.index_cast %175 : i32 to index
    %c0_100 = arith.constant 0 : index
    %177 = vector.load %arg6[%176, %c0_100] : memref<64x128xf32, #tpu.memory_space<vmem>>, vector<8x128xf32>
    %c0_101 = arith.constant 0 : index
    %c0_102 = arith.constant 0 : index
    %178 = vector.load %arg7[%c0_101, %c0_102] : memref<8x32xf32, #tpu.memory_space<vmem>>, vector<8x32xf32>
    %cst_103 = arith.constant dense<0.000000e+00> : vector<8x128xf32>
    %179 = tpu.matmul %178, %14, %cst_103 {dimension_numbers = #tpu.dot_dimension_numbers<[1], [0], [0], [1], [0, 0, 1, 1], [], []>} : vector<8x32xf32>, vector<32x128xf32>, vector<8x128xf32> -> vector<8x128xf32>
    %180 = arith.addf %177, %179 : vector<8x128xf32>
    %181 = arith.negf %180 : vector<8x128xf32>
    %182 = math.exp %181 : vector<8x128xf32>
    %cst_104 = arith.constant 1.000000e+00 : f32
    %183 = vector.broadcast %cst_104 : f32 to vector<8x128xf32>
    %184 = arith.addf %183, %182 : vector<8x128xf32>
    %185 = arith.divf %183, %184 : vector<8x128xf32>
    %186 = math.tanh %180 : vector<8x128xf32>
    %187 = vector.extract_strided_slice %185 {offsets = [0, 0], sizes = [8, 32], strides = [1, 1]} : vector<8x128xf32> to vector<8x32xf32>
    %188 = vector.extract_strided_slice %185 {offsets = [0, 32], sizes = [8, 32], strides = [1, 1]} : vector<8x128xf32> to vector<8x32xf32>
    %189 = vector.extract_strided_slice %186 {offsets = [0, 64], sizes = [8, 32], strides = [1, 1]} : vector<8x128xf32> to vector<8x32xf32>
    %190 = vector.extract_strided_slice %185 {offsets = [0, 96], sizes = [8, 32], strides = [1, 1]} : vector<8x128xf32> to vector<8x32xf32>
    %c0_105 = arith.constant 0 : index
    %c0_106 = arith.constant 0 : index
    %191 = vector.load %arg8[%c0_105, %c0_106] : memref<8x32xf32, #tpu.memory_space<vmem>>, vector<8x32xf32>
    %192 = arith.mulf %188, %191 : vector<8x32xf32>
    %193 = arith.mulf %187, %189 : vector<8x32xf32>
    %194 = arith.addf %192, %193 : vector<8x32xf32>
    %195 = math.tanh %194 : vector<8x32xf32>
    %196 = arith.mulf %190, %195 : vector<8x32xf32>
    %c0_107 = arith.constant 0 : index
    %c0_108 = arith.constant 0 : index
    %197 = vector.load %arg8[%c0_107, %c0_108] : memref<8x32xf32, #tpu.memory_space<vmem>>, vector<8x32xf32>
    tpu.vector_store %arg8[%c0_107, %c0_108], %194 {strides = array<i32>} : memref<8x32xf32, #tpu.memory_space<vmem>>, vector<8x32xf32>,
    %c0_109 = arith.constant 0 : index
    %c0_110 = arith.constant 0 : index
    %198 = vector.load %arg7[%c0_109, %c0_110] : memref<8x32xf32, #tpu.memory_space<vmem>>, vector<8x32xf32>
    tpu.vector_store %arg7[%c0_109, %c0_110], %196 {strides = array<i32>} : memref<8x32xf32, #tpu.memory_space<vmem>>, vector<8x32xf32>,
    %199 = arith.index_cast %175 : i32 to index
    %c0_111 = arith.constant 0 : index
    %200 = vector.load %arg5[%199, %c0_111] : memref<64x64xf32, #tpu.memory_space<vmem>>, vector<8x32xf32>
    tpu.vector_store %arg5[%199, %c0_111], %196 {strides = array<i32>} : memref<64x64xf32, #tpu.memory_space<vmem>>, vector<8x32xf32>,
    %c6_i32 = arith.constant 6 : i32
    %c2_i32_112 = arith.constant 2 : i32
    %201 = arith.muli %c2_i32_112, %c6_i32 : i32
    %c7_i32_113 = arith.constant 7 : i32
    %202 = arith.subi %c7_i32_113, %201 : i32
    %c0_i32_114 = arith.constant 0 : i32
    %203 = arith.muli %c0_i32_114, %202 : i32
    %204 = arith.addi %c6_i32, %203 : i32
    %c8_i32_115 = arith.constant 8 : i32
    %205 = arith.muli %204, %c8_i32_115 : i32
    %206 = tpu.assume_multiple %205, 8 : i32
    %207 = arith.index_cast %206 : i32 to index
    %c0_116 = arith.constant 0 : index
    %208 = vector.load %arg6[%207, %c0_116] : memref<64x128xf32, #tpu.memory_space<vmem>>, vector<8x128xf32>
    %c0_117 = arith.constant 0 : index
    %c0_118 = arith.constant 0 : index
    %209 = vector.load %arg7[%c0_117, %c0_118] : memref<8x32xf32, #tpu.memory_space<vmem>>, vector<8x32xf32>
    %cst_119 = arith.constant dense<0.000000e+00> : vector<8x128xf32>
    %210 = tpu.matmul %209, %14, %cst_119 {dimension_numbers = #tpu.dot_dimension_numbers<[1], [0], [0], [1], [0, 0, 1, 1], [], []>} : vector<8x32xf32>, vector<32x128xf32>, vector<8x128xf32> -> vector<8x128xf32>
    %211 = arith.addf %208, %210 : vector<8x128xf32>
    %212 = arith.negf %211 : vector<8x128xf32>
    %213 = math.exp %212 : vector<8x128xf32>
    %cst_120 = arith.constant 1.000000e+00 : f32
    %214 = vector.broadcast %cst_120 : f32 to vector<8x128xf32>
    %215 = arith.addf %214, %213 : vector<8x128xf32>
    %216 = arith.divf %214, %215 : vector<8x128xf32>
    %217 = math.tanh %211 : vector<8x128xf32>
    %218 = vector.extract_strided_slice %216 {offsets = [0, 0], sizes = [8, 32], strides = [1, 1]} : vector<8x128xf32> to vector<8x32xf32>
    %219 = vector.extract_strided_slice %216 {offsets = [0, 32], sizes = [8, 32], strides = [1, 1]} : vector<8x128xf32> to vector<8x32xf32>
    %220 = vector.extract_strided_slice %217 {offsets = [0, 64], sizes = [8, 32], strides = [1, 1]} : vector<8x128xf32> to vector<8x32xf32>
    %221 = vector.extract_strided_slice %216 {offsets = [0, 96], sizes = [8, 32], strides = [1, 1]} : vector<8x128xf32> to vector<8x32xf32>
    %c0_121 = arith.constant 0 : index
    %c0_122 = arith.constant 0 : index
    %222 = vector.load %arg8[%c0_121, %c0_122] : memref<8x32xf32, #tpu.memory_space<vmem>>, vector<8x32xf32>
    %223 = arith.mulf %219, %222 : vector<8x32xf32>
    %224 = arith.mulf %218, %220 : vector<8x32xf32>
    %225 = arith.addf %223, %224 : vector<8x32xf32>
    %226 = math.tanh %225 : vector<8x32xf32>
    %227 = arith.mulf %221, %226 : vector<8x32xf32>
    %c0_123 = arith.constant 0 : index
    %c0_124 = arith.constant 0 : index
    %228 = vector.load %arg8[%c0_123, %c0_124] : memref<8x32xf32, #tpu.memory_space<vmem>>, vector<8x32xf32>
    tpu.vector_store %arg8[%c0_123, %c0_124], %225 {strides = array<i32>} : memref<8x32xf32, #tpu.memory_space<vmem>>, vector<8x32xf32>,
    %c0_125 = arith.constant 0 : index
    %c0_126 = arith.constant 0 : index
    %229 = vector.load %arg7[%c0_125, %c0_126] : memref<8x32xf32, #tpu.memory_space<vmem>>, vector<8x32xf32>
    tpu.vector_store %arg7[%c0_125, %c0_126], %227 {strides = array<i32>} : memref<8x32xf32, #tpu.memory_space<vmem>>, vector<8x32xf32>,
    %230 = arith.index_cast %206 : i32 to index
    %c0_127 = arith.constant 0 : index
    %231 = vector.load %arg5[%230, %c0_127] : memref<64x64xf32, #tpu.memory_space<vmem>>, vector<8x32xf32>
    tpu.vector_store %arg5[%230, %c0_127], %227 {strides = array<i32>} : memref<64x64xf32, #tpu.memory_space<vmem>>, vector<8x32xf32>,
    %c7_i32_128 = arith.constant 7 : i32
    %c2_i32_129 = arith.constant 2 : i32
    %232 = arith.muli %c2_i32_129, %c7_i32_128 : i32
    %c7_i32_130 = arith.constant 7 : i32
    %233 = arith.subi %c7_i32_130, %232 : i32
    %c0_i32_131 = arith.constant 0 : i32
    %234 = arith.muli %c0_i32_131, %233 : i32
    %235 = arith.addi %c7_i32_128, %234 : i32
    %c8_i32_132 = arith.constant 8 : i32
    %236 = arith.muli %235, %c8_i32_132 : i32
    %237 = tpu.assume_multiple %236, 8 : i32
    %238 = arith.index_cast %237 : i32 to index
    %c0_133 = arith.constant 0 : index
    %239 = vector.load %arg6[%238, %c0_133] : memref<64x128xf32, #tpu.memory_space<vmem>>, vector<8x128xf32>
    %c0_134 = arith.constant 0 : index
    %c0_135 = arith.constant 0 : index
    %240 = vector.load %arg7[%c0_134, %c0_135] : memref<8x32xf32, #tpu.memory_space<vmem>>, vector<8x32xf32>
    %cst_136 = arith.constant dense<0.000000e+00> : vector<8x128xf32>
    %241 = tpu.matmul %240, %14, %cst_136 {dimension_numbers = #tpu.dot_dimension_numbers<[1], [0], [0], [1], [0, 0, 1, 1], [], []>} : vector<8x32xf32>, vector<32x128xf32>, vector<8x128xf32> -> vector<8x128xf32>
    %242 = arith.addf %239, %241 : vector<8x128xf32>
    %243 = arith.negf %242 : vector<8x128xf32>
    %244 = math.exp %243 : vector<8x128xf32>
    %cst_137 = arith.constant 1.000000e+00 : f32
    %245 = vector.broadcast %cst_137 : f32 to vector<8x128xf32>
    %246 = arith.addf %245, %244 : vector<8x128xf32>
    %247 = arith.divf %245, %246 : vector<8x128xf32>
    %248 = math.tanh %242 : vector<8x128xf32>
    %249 = vector.extract_strided_slice %247 {offsets = [0, 0], sizes = [8, 32], strides = [1, 1]} : vector<8x128xf32> to vector<8x32xf32>
    %250 = vector.extract_strided_slice %247 {offsets = [0, 32], sizes = [8, 32], strides = [1, 1]} : vector<8x128xf32> to vector<8x32xf32>
    %251 = vector.extract_strided_slice %248 {offsets = [0, 64], sizes = [8, 32], strides = [1, 1]} : vector<8x128xf32> to vector<8x32xf32>
    %252 = vector.extract_strided_slice %247 {offsets = [0, 96], sizes = [8, 32], strides = [1, 1]} : vector<8x128xf32> to vector<8x32xf32>
    %c0_138 = arith.constant 0 : index
    %c0_139 = arith.constant 0 : index
    %253 = vector.load %arg8[%c0_138, %c0_139] : memref<8x32xf32, #tpu.memory_space<vmem>>, vector<8x32xf32>
    %254 = arith.mulf %250, %253 : vector<8x32xf32>
    %255 = arith.mulf %249, %251 : vector<8x32xf32>
    %256 = arith.addf %254, %255 : vector<8x32xf32>
    %257 = math.tanh %256 : vector<8x32xf32>
    %258 = arith.mulf %252, %257 : vector<8x32xf32>
    %c0_140 = arith.constant 0 : index
    %c0_141 = arith.constant 0 : index
    %259 = vector.load %arg8[%c0_140, %c0_141] : memref<8x32xf32, #tpu.memory_space<vmem>>, vector<8x32xf32>
    tpu.vector_store %arg8[%c0_140, %c0_141], %256 {strides = array<i32>} : memref<8x32xf32, #tpu.memory_space<vmem>>, vector<8x32xf32>,
    %c0_142 = arith.constant 0 : index
    %c0_143 = arith.constant 0 : index
    %260 = vector.load %arg7[%c0_142, %c0_143] : memref<8x32xf32, #tpu.memory_space<vmem>>, vector<8x32xf32>
    tpu.vector_store %arg7[%c0_142, %c0_143], %258 {strides = array<i32>} : memref<8x32xf32, #tpu.memory_space<vmem>>, vector<8x32xf32>,
    %261 = arith.index_cast %237 : i32 to index
    %c0_144 = arith.constant 0 : index
    %262 = vector.load %arg5[%261, %c0_144] : memref<64x64xf32, #tpu.memory_space<vmem>>, vector<8x32xf32>
    tpu.vector_store %arg5[%261, %c0_144], %258 {strides = array<i32>} : memref<64x64xf32, #tpu.memory_space<vmem>>, vector<8x32xf32>,
    %c8_i32_145 = arith.constant 8 : i32
    %c1 = arith.constant 1 : index
    %c0_146 = arith.constant 0 : index
    %c0_147 = arith.constant 0 : index
    %263 = vector.load %arg2[%c1, %c0_146, %c0_147] : memref<2x16x128xf32, #tpu.memory_space<vmem>>, vector<1x16x128xf32>
    %264 = vector.shape_cast %263 : vector<1x16x128xf32> to vector<16x128xf32>
    %cst_148 = arith.constant dense<0.000000e+00> : vector<64x128xf32>
    %265 = tpu.matmul %0, %264, %cst_148 {dimension_numbers = #tpu.dot_dimension_numbers<[1], [0], [0], [1], [0, 0, 1, 1], [], []>} : vector<64x16xf32>, vector<16x128xf32>, vector<64x128xf32> -> vector<64x128xf32>
    %c1_149 = arith.constant 1 : index
    %c0_150 = arith.constant 0 : index
    %c0_151 = arith.constant 0 : index
    %266 = vector.load %arg4[%c1_149, %c0_150, %c0_151] : memref<2x1x128xf32, #tpu.memory_space<vmem>>, vector<1x1x128xf32>
    %267 = vector.shape_cast %266 : vector<1x1x128xf32> to vector<1x128xf32>
    %268 = vector.broadcast %267 : vector<1x128xf32> to vector<64x128xf32>
    %269 = arith.addf %265, %268 : vector<64x128xf32>
    %c0_152 = arith.constant 0 : index
    %c0_153 = arith.constant 0 : index
    %270 = vector.load %arg6[%c0_152, %c0_153] : memref<64x128xf32, #tpu.memory_space<vmem>>, vector<64x128xf32>
    tpu.vector_store %arg6[%c0_152, %c0_153], %269 {strides = array<i32>} : memref<64x128xf32, #tpu.memory_space<vmem>>, vector<64x128xf32>,
    %cst_154 = arith.constant 0.000000e+00 : f32
    %271 = vector.broadcast %cst_154 : f32 to vector<8x32xf32>
    %c0_155 = arith.constant 0 : index
    %c0_156 = arith.constant 0 : index
    %272 = vector.load %arg7[%c0_155, %c0_156] : memref<8x32xf32, #tpu.memory_space<vmem>>, vector<8x32xf32>
    tpu.vector_store %arg7[%c0_155, %c0_156], %271 {strides = array<i32>} : memref<8x32xf32, #tpu.memory_space<vmem>>, vector<8x32xf32>,
    %cst_157 = arith.constant 0.000000e+00 : f32
    %273 = vector.broadcast %cst_157 : f32 to vector<8x32xf32>
    %c0_158 = arith.constant 0 : index
    %c0_159 = arith.constant 0 : index
    %274 = vector.load %arg8[%c0_158, %c0_159] : memref<8x32xf32, #tpu.memory_space<vmem>>, vector<8x32xf32>
    tpu.vector_store %arg8[%c0_158, %c0_159], %273 {strides = array<i32>} : memref<8x32xf32, #tpu.memory_space<vmem>>, vector<8x32xf32>,
    %c1_160 = arith.constant 1 : index
    %c0_161 = arith.constant 0 : index
    %c0_162 = arith.constant 0 : index
    %275 = vector.load %arg3[%c1_160, %c0_161, %c0_162] : memref<2x32x128xf32, #tpu.memory_space<vmem>>, vector<1x32x128xf32>
    %276 = vector.shape_cast %275 : vector<1x32x128xf32> to vector<32x128xf32>
    %c0_i32_163 = arith.constant 0 : i32
    %c2_i32_164 = arith.constant 2 : i32
    %277 = arith.muli %c2_i32_164, %c0_i32_163 : i32
    %c7_i32_165 = arith.constant 7 : i32
    %278 = arith.subi %c7_i32_165, %277 : i32
    %c1_i32_166 = arith.constant 1 : i32
    %279 = arith.muli %c1_i32_166, %278 : i32
    %280 = arith.addi %c0_i32_163, %279 : i32
    %c8_i32_167 = arith.constant 8 : i32
    %281 = arith.muli %280, %c8_i32_167 : i32
    %282 = tpu.assume_multiple %281, 8 : i32
    %283 = arith.index_cast %282 : i32 to index
    %c0_168 = arith.constant 0 : index
    %284 = vector.load %arg6[%283, %c0_168] : memref<64x128xf32, #tpu.memory_space<vmem>>, vector<8x128xf32>
    %c0_169 = arith.constant 0 : index
    %c0_170 = arith.constant 0 : index
    %285 = vector.load %arg7[%c0_169, %c0_170] : memref<8x32xf32, #tpu.memory_space<vmem>>, vector<8x32xf32>
    %cst_171 = arith.constant dense<0.000000e+00> : vector<8x128xf32>
    %286 = tpu.matmul %285, %276, %cst_171 {dimension_numbers = #tpu.dot_dimension_numbers<[1], [0], [0], [1], [0, 0, 1, 1], [], []>} : vector<8x32xf32>, vector<32x128xf32>, vector<8x128xf32> -> vector<8x128xf32>
    %287 = arith.addf %284, %286 : vector<8x128xf32>
    %288 = arith.negf %287 : vector<8x128xf32>
    %289 = math.exp %288 : vector<8x128xf32>
    %cst_172 = arith.constant 1.000000e+00 : f32
    %290 = vector.broadcast %cst_172 : f32 to vector<8x128xf32>
    %291 = arith.addf %290, %289 : vector<8x128xf32>
    %292 = arith.divf %290, %291 : vector<8x128xf32>
    %293 = math.tanh %287 : vector<8x128xf32>
    %294 = vector.extract_strided_slice %292 {offsets = [0, 0], sizes = [8, 32], strides = [1, 1]} : vector<8x128xf32> to vector<8x32xf32>
    %295 = vector.extract_strided_slice %292 {offsets = [0, 32], sizes = [8, 32], strides = [1, 1]} : vector<8x128xf32> to vector<8x32xf32>
    %296 = vector.extract_strided_slice %293 {offsets = [0, 64], sizes = [8, 32], strides = [1, 1]} : vector<8x128xf32> to vector<8x32xf32>
    %297 = vector.extract_strided_slice %292 {offsets = [0, 96], sizes = [8, 32], strides = [1, 1]} : vector<8x128xf32> to vector<8x32xf32>
    %c0_173 = arith.constant 0 : index
    %c0_174 = arith.constant 0 : index
    %298 = vector.load %arg8[%c0_173, %c0_174] : memref<8x32xf32, #tpu.memory_space<vmem>>, vector<8x32xf32>
    %299 = arith.mulf %295, %298 : vector<8x32xf32>
    %300 = arith.mulf %294, %296 : vector<8x32xf32>
    %301 = arith.addf %299, %300 : vector<8x32xf32>
    %302 = math.tanh %301 : vector<8x32xf32>
    %303 = arith.mulf %297, %302 : vector<8x32xf32>
    %c0_175 = arith.constant 0 : index
    %c0_176 = arith.constant 0 : index
    %304 = vector.load %arg8[%c0_175, %c0_176] : memref<8x32xf32, #tpu.memory_space<vmem>>, vector<8x32xf32>
    tpu.vector_store %arg8[%c0_175, %c0_176], %301 {strides = array<i32>} : memref<8x32xf32, #tpu.memory_space<vmem>>, vector<8x32xf32>,
    %c0_177 = arith.constant 0 : index
    %c0_178 = arith.constant 0 : index
    %305 = vector.load %arg7[%c0_177, %c0_178] : memref<8x32xf32, #tpu.memory_space<vmem>>, vector<8x32xf32>
    tpu.vector_store %arg7[%c0_177, %c0_178], %303 {strides = array<i32>} : memref<8x32xf32, #tpu.memory_space<vmem>>, vector<8x32xf32>,
    %306 = arith.index_cast %282 : i32 to index
    %c32 = arith.constant 32 : index
    %307 = vector.load %arg5[%306, %c32] : memref<64x64xf32, #tpu.memory_space<vmem>>, vector<8x32xf32>
    tpu.vector_store %arg5[%306, %c32], %303 {strides = array<i32>} : memref<64x64xf32, #tpu.memory_space<vmem>>, vector<8x32xf32>,
    %c1_i32_179 = arith.constant 1 : i32
    %c2_i32_180 = arith.constant 2 : i32
    %308 = arith.muli %c2_i32_180, %c1_i32_179 : i32
    %c7_i32_181 = arith.constant 7 : i32
    %309 = arith.subi %c7_i32_181, %308 : i32
    %c1_i32_182 = arith.constant 1 : i32
    %310 = arith.muli %c1_i32_182, %309 : i32
    %311 = arith.addi %c1_i32_179, %310 : i32
    %c8_i32_183 = arith.constant 8 : i32
    %312 = arith.muli %311, %c8_i32_183 : i32
    %313 = tpu.assume_multiple %312, 8 : i32
    %314 = arith.index_cast %313 : i32 to index
    %c0_184 = arith.constant 0 : index
    %315 = vector.load %arg6[%314, %c0_184] : memref<64x128xf32, #tpu.memory_space<vmem>>, vector<8x128xf32>
    %c0_185 = arith.constant 0 : index
    %c0_186 = arith.constant 0 : index
    %316 = vector.load %arg7[%c0_185, %c0_186] : memref<8x32xf32, #tpu.memory_space<vmem>>, vector<8x32xf32>
    %cst_187 = arith.constant dense<0.000000e+00> : vector<8x128xf32>
    %317 = tpu.matmul %316, %276, %cst_187 {dimension_numbers = #tpu.dot_dimension_numbers<[1], [0], [0], [1], [0, 0, 1, 1], [], []>} : vector<8x32xf32>, vector<32x128xf32>, vector<8x128xf32> -> vector<8x128xf32>
    %318 = arith.addf %315, %317 : vector<8x128xf32>
    %319 = arith.negf %318 : vector<8x128xf32>
    %320 = math.exp %319 : vector<8x128xf32>
    %cst_188 = arith.constant 1.000000e+00 : f32
    %321 = vector.broadcast %cst_188 : f32 to vector<8x128xf32>
    %322 = arith.addf %321, %320 : vector<8x128xf32>
    %323 = arith.divf %321, %322 : vector<8x128xf32>
    %324 = math.tanh %318 : vector<8x128xf32>
    %325 = vector.extract_strided_slice %323 {offsets = [0, 0], sizes = [8, 32], strides = [1, 1]} : vector<8x128xf32> to vector<8x32xf32>
    %326 = vector.extract_strided_slice %323 {offsets = [0, 32], sizes = [8, 32], strides = [1, 1]} : vector<8x128xf32> to vector<8x32xf32>
    %327 = vector.extract_strided_slice %324 {offsets = [0, 64], sizes = [8, 32], strides = [1, 1]} : vector<8x128xf32> to vector<8x32xf32>
    %328 = vector.extract_strided_slice %323 {offsets = [0, 96], sizes = [8, 32], strides = [1, 1]} : vector<8x128xf32> to vector<8x32xf32>
    %c0_189 = arith.constant 0 : index
    %c0_190 = arith.constant 0 : index
    %329 = vector.load %arg8[%c0_189, %c0_190] : memref<8x32xf32, #tpu.memory_space<vmem>>, vector<8x32xf32>
    %330 = arith.mulf %326, %329 : vector<8x32xf32>
    %331 = arith.mulf %325, %327 : vector<8x32xf32>
    %332 = arith.addf %330, %331 : vector<8x32xf32>
    %333 = math.tanh %332 : vector<8x32xf32>
    %334 = arith.mulf %328, %333 : vector<8x32xf32>
    %c0_191 = arith.constant 0 : index
    %c0_192 = arith.constant 0 : index
    %335 = vector.load %arg8[%c0_191, %c0_192] : memref<8x32xf32, #tpu.memory_space<vmem>>, vector<8x32xf32>
    tpu.vector_store %arg8[%c0_191, %c0_192], %332 {strides = array<i32>} : memref<8x32xf32, #tpu.memory_space<vmem>>, vector<8x32xf32>,
    %c0_193 = arith.constant 0 : index
    %c0_194 = arith.constant 0 : index
    %336 = vector.load %arg7[%c0_193, %c0_194] : memref<8x32xf32, #tpu.memory_space<vmem>>, vector<8x32xf32>
    tpu.vector_store %arg7[%c0_193, %c0_194], %334 {strides = array<i32>} : memref<8x32xf32, #tpu.memory_space<vmem>>, vector<8x32xf32>,
    %337 = arith.index_cast %313 : i32 to index
    %c32_195 = arith.constant 32 : index
    %338 = vector.load %arg5[%337, %c32_195] : memref<64x64xf32, #tpu.memory_space<vmem>>, vector<8x32xf32>
    tpu.vector_store %arg5[%337, %c32_195], %334 {strides = array<i32>} : memref<64x64xf32, #tpu.memory_space<vmem>>, vector<8x32xf32>,
    %c2_i32_196 = arith.constant 2 : i32
    %c2_i32_197 = arith.constant 2 : i32
    %339 = arith.muli %c2_i32_197, %c2_i32_196 : i32
    %c7_i32_198 = arith.constant 7 : i32
    %340 = arith.subi %c7_i32_198, %339 : i32
    %c1_i32_199 = arith.constant 1 : i32
    %341 = arith.muli %c1_i32_199, %340 : i32
    %342 = arith.addi %c2_i32_196, %341 : i32
    %c8_i32_200 = arith.constant 8 : i32
    %343 = arith.muli %342, %c8_i32_200 : i32
    %344 = tpu.assume_multiple %343, 8 : i32
    %345 = arith.index_cast %344 : i32 to index
    %c0_201 = arith.constant 0 : index
    %346 = vector.load %arg6[%345, %c0_201] : memref<64x128xf32, #tpu.memory_space<vmem>>, vector<8x128xf32>
    %c0_202 = arith.constant 0 : index
    %c0_203 = arith.constant 0 : index
    %347 = vector.load %arg7[%c0_202, %c0_203] : memref<8x32xf32, #tpu.memory_space<vmem>>, vector<8x32xf32>
    %cst_204 = arith.constant dense<0.000000e+00> : vector<8x128xf32>
    %348 = tpu.matmul %347, %276, %cst_204 {dimension_numbers = #tpu.dot_dimension_numbers<[1], [0], [0], [1], [0, 0, 1, 1], [], []>} : vector<8x32xf32>, vector<32x128xf32>, vector<8x128xf32> -> vector<8x128xf32>
    %349 = arith.addf %346, %348 : vector<8x128xf32>
    %350 = arith.negf %349 : vector<8x128xf32>
    %351 = math.exp %350 : vector<8x128xf32>
    %cst_205 = arith.constant 1.000000e+00 : f32
    %352 = vector.broadcast %cst_205 : f32 to vector<8x128xf32>
    %353 = arith.addf %352, %351 : vector<8x128xf32>
    %354 = arith.divf %352, %353 : vector<8x128xf32>
    %355 = math.tanh %349 : vector<8x128xf32>
    %356 = vector.extract_strided_slice %354 {offsets = [0, 0], sizes = [8, 32], strides = [1, 1]} : vector<8x128xf32> to vector<8x32xf32>
    %357 = vector.extract_strided_slice %354 {offsets = [0, 32], sizes = [8, 32], strides = [1, 1]} : vector<8x128xf32> to vector<8x32xf32>
    %358 = vector.extract_strided_slice %355 {offsets = [0, 64], sizes = [8, 32], strides = [1, 1]} : vector<8x128xf32> to vector<8x32xf32>
    %359 = vector.extract_strided_slice %354 {offsets = [0, 96], sizes = [8, 32], strides = [1, 1]} : vector<8x128xf32> to vector<8x32xf32>
    %c0_206 = arith.constant 0 : index
    %c0_207 = arith.constant 0 : index
    %360 = vector.load %arg8[%c0_206, %c0_207] : memref<8x32xf32, #tpu.memory_space<vmem>>, vector<8x32xf32>
    %361 = arith.mulf %357, %360 : vector<8x32xf32>
    %362 = arith.mulf %356, %358 : vector<8x32xf32>
    %363 = arith.addf %361, %362 : vector<8x32xf32>
    %364 = math.tanh %363 : vector<8x32xf32>
    %365 = arith.mulf %359, %364 : vector<8x32xf32>
    %c0_208 = arith.constant 0 : index
    %c0_209 = arith.constant 0 : index
    %366 = vector.load %arg8[%c0_208, %c0_209] : memref<8x32xf32, #tpu.memory_space<vmem>>, vector<8x32xf32>
    tpu.vector_store %arg8[%c0_208, %c0_209], %363 {strides = array<i32>} : memref<8x32xf32, #tpu.memory_space<vmem>>, vector<8x32xf32>,
    %c0_210 = arith.constant 0 : index
    %c0_211 = arith.constant 0 : index
    %367 = vector.load %arg7[%c0_210, %c0_211] : memref<8x32xf32, #tpu.memory_space<vmem>>, vector<8x32xf32>
    tpu.vector_store %arg7[%c0_210, %c0_211], %365 {strides = array<i32>} : memref<8x32xf32, #tpu.memory_space<vmem>>, vector<8x32xf32>,
    %368 = arith.index_cast %344 : i32 to index
    %c32_212 = arith.constant 32 : index
    %369 = vector.load %arg5[%368, %c32_212] : memref<64x64xf32, #tpu.memory_space<vmem>>, vector<8x32xf32>
    tpu.vector_store %arg5[%368, %c32_212], %365 {strides = array<i32>} : memref<64x64xf32, #tpu.memory_space<vmem>>, vector<8x32xf32>,
    %c3_i32_213 = arith.constant 3 : i32
    %c2_i32_214 = arith.constant 2 : i32
    %370 = arith.muli %c2_i32_214, %c3_i32_213 : i32
    %c7_i32_215 = arith.constant 7 : i32
    %371 = arith.subi %c7_i32_215, %370 : i32
    %c1_i32_216 = arith.constant 1 : i32
    %372 = arith.muli %c1_i32_216, %371 : i32
    %373 = arith.addi %c3_i32_213, %372 : i32
    %c8_i32_217 = arith.constant 8 : i32
    %374 = arith.muli %373, %c8_i32_217 : i32
    %375 = tpu.assume_multiple %374, 8 : i32
    %376 = arith.index_cast %375 : i32 to index
    %c0_218 = arith.constant 0 : index
    %377 = vector.load %arg6[%376, %c0_218] : memref<64x128xf32, #tpu.memory_space<vmem>>, vector<8x128xf32>
    %c0_219 = arith.constant 0 : index
    %c0_220 = arith.constant 0 : index
    %378 = vector.load %arg7[%c0_219, %c0_220] : memref<8x32xf32, #tpu.memory_space<vmem>>, vector<8x32xf32>
    %cst_221 = arith.constant dense<0.000000e+00> : vector<8x128xf32>
    %379 = tpu.matmul %378, %276, %cst_221 {dimension_numbers = #tpu.dot_dimension_numbers<[1], [0], [0], [1], [0, 0, 1, 1], [], []>} : vector<8x32xf32>, vector<32x128xf32>, vector<8x128xf32> -> vector<8x128xf32>
    %380 = arith.addf %377, %379 : vector<8x128xf32>
    %381 = arith.negf %380 : vector<8x128xf32>
    %382 = math.exp %381 : vector<8x128xf32>
    %cst_222 = arith.constant 1.000000e+00 : f32
    %383 = vector.broadcast %cst_222 : f32 to vector<8x128xf32>
    %384 = arith.addf %383, %382 : vector<8x128xf32>
    %385 = arith.divf %383, %384 : vector<8x128xf32>
    %386 = math.tanh %380 : vector<8x128xf32>
    %387 = vector.extract_strided_slice %385 {offsets = [0, 0], sizes = [8, 32], strides = [1, 1]} : vector<8x128xf32> to vector<8x32xf32>
    %388 = vector.extract_strided_slice %385 {offsets = [0, 32], sizes = [8, 32], strides = [1, 1]} : vector<8x128xf32> to vector<8x32xf32>
    %389 = vector.extract_strided_slice %386 {offsets = [0, 64], sizes = [8, 32], strides = [1, 1]} : vector<8x128xf32> to vector<8x32xf32>
    %390 = vector.extract_strided_slice %385 {offsets = [0, 96], sizes = [8, 32], strides = [1, 1]} : vector<8x128xf32> to vector<8x32xf32>
    %c0_223 = arith.constant 0 : index
    %c0_224 = arith.constant 0 : index
    %391 = vector.load %arg8[%c0_223, %c0_224] : memref<8x32xf32, #tpu.memory_space<vmem>>, vector<8x32xf32>
    %392 = arith.mulf %388, %391 : vector<8x32xf32>
    %393 = arith.mulf %387, %389 : vector<8x32xf32>
    %394 = arith.addf %392, %393 : vector<8x32xf32>
    %395 = math.tanh %394 : vector<8x32xf32>
    %396 = arith.mulf %390, %395 : vector<8x32xf32>
    %c0_225 = arith.constant 0 : index
    %c0_226 = arith.constant 0 : index
    %397 = vector.load %arg8[%c0_225, %c0_226] : memref<8x32xf32, #tpu.memory_space<vmem>>, vector<8x32xf32>
    tpu.vector_store %arg8[%c0_225, %c0_226], %394 {strides = array<i32>} : memref<8x32xf32, #tpu.memory_space<vmem>>, vector<8x32xf32>,
    %c0_227 = arith.constant 0 : index
    %c0_228 = arith.constant 0 : index
    %398 = vector.load %arg7[%c0_227, %c0_228] : memref<8x32xf32, #tpu.memory_space<vmem>>, vector<8x32xf32>
    tpu.vector_store %arg7[%c0_227, %c0_228], %396 {strides = array<i32>} : memref<8x32xf32, #tpu.memory_space<vmem>>, vector<8x32xf32>,
    %399 = arith.index_cast %375 : i32 to index
    %c32_229 = arith.constant 32 : index
    %400 = vector.load %arg5[%399, %c32_229] : memref<64x64xf32, #tpu.memory_space<vmem>>, vector<8x32xf32>
    tpu.vector_store %arg5[%399, %c32_229], %396 {strides = array<i32>} : memref<64x64xf32, #tpu.memory_space<vmem>>, vector<8x32xf32>,
    %c4_i32_230 = arith.constant 4 : i32
    %c2_i32_231 = arith.constant 2 : i32
    %401 = arith.muli %c2_i32_231, %c4_i32_230 : i32
    %c7_i32_232 = arith.constant 7 : i32
    %402 = arith.subi %c7_i32_232, %401 : i32
    %c1_i32_233 = arith.constant 1 : i32
    %403 = arith.muli %c1_i32_233, %402 : i32
    %404 = arith.addi %c4_i32_230, %403 : i32
    %c8_i32_234 = arith.constant 8 : i32
    %405 = arith.muli %404, %c8_i32_234 : i32
    %406 = tpu.assume_multiple %405, 8 : i32
    %407 = arith.index_cast %406 : i32 to index
    %c0_235 = arith.constant 0 : index
    %408 = vector.load %arg6[%407, %c0_235] : memref<64x128xf32, #tpu.memory_space<vmem>>, vector<8x128xf32>
    %c0_236 = arith.constant 0 : index
    %c0_237 = arith.constant 0 : index
    %409 = vector.load %arg7[%c0_236, %c0_237] : memref<8x32xf32, #tpu.memory_space<vmem>>, vector<8x32xf32>
    %cst_238 = arith.constant dense<0.000000e+00> : vector<8x128xf32>
    %410 = tpu.matmul %409, %276, %cst_238 {dimension_numbers = #tpu.dot_dimension_numbers<[1], [0], [0], [1], [0, 0, 1, 1], [], []>} : vector<8x32xf32>, vector<32x128xf32>, vector<8x128xf32> -> vector<8x128xf32>
    %411 = arith.addf %408, %410 : vector<8x128xf32>
    %412 = arith.negf %411 : vector<8x128xf32>
    %413 = math.exp %412 : vector<8x128xf32>
    %cst_239 = arith.constant 1.000000e+00 : f32
    %414 = vector.broadcast %cst_239 : f32 to vector<8x128xf32>
    %415 = arith.addf %414, %413 : vector<8x128xf32>
    %416 = arith.divf %414, %415 : vector<8x128xf32>
    %417 = math.tanh %411 : vector<8x128xf32>
    %418 = vector.extract_strided_slice %416 {offsets = [0, 0], sizes = [8, 32], strides = [1, 1]} : vector<8x128xf32> to vector<8x32xf32>
    %419 = vector.extract_strided_slice %416 {offsets = [0, 32], sizes = [8, 32], strides = [1, 1]} : vector<8x128xf32> to vector<8x32xf32>
    %420 = vector.extract_strided_slice %417 {offsets = [0, 64], sizes = [8, 32], strides = [1, 1]} : vector<8x128xf32> to vector<8x32xf32>
    %421 = vector.extract_strided_slice %416 {offsets = [0, 96], sizes = [8, 32], strides = [1, 1]} : vector<8x128xf32> to vector<8x32xf32>
    %c0_240 = arith.constant 0 : index
    %c0_241 = arith.constant 0 : index
    %422 = vector.load %arg8[%c0_240, %c0_241] : memref<8x32xf32, #tpu.memory_space<vmem>>, vector<8x32xf32>
    %423 = arith.mulf %419, %422 : vector<8x32xf32>
    %424 = arith.mulf %418, %420 : vector<8x32xf32>
    %425 = arith.addf %423, %424 : vector<8x32xf32>
    %426 = math.tanh %425 : vector<8x32xf32>
    %427 = arith.mulf %421, %426 : vector<8x32xf32>
    %c0_242 = arith.constant 0 : index
    %c0_243 = arith.constant 0 : index
    %428 = vector.load %arg8[%c0_242, %c0_243] : memref<8x32xf32, #tpu.memory_space<vmem>>, vector<8x32xf32>
    tpu.vector_store %arg8[%c0_242, %c0_243], %425 {strides = array<i32>} : memref<8x32xf32, #tpu.memory_space<vmem>>, vector<8x32xf32>,
    %c0_244 = arith.constant 0 : index
    %c0_245 = arith.constant 0 : index
    %429 = vector.load %arg7[%c0_244, %c0_245] : memref<8x32xf32, #tpu.memory_space<vmem>>, vector<8x32xf32>
    tpu.vector_store %arg7[%c0_244, %c0_245], %427 {strides = array<i32>} : memref<8x32xf32, #tpu.memory_space<vmem>>, vector<8x32xf32>,
    %430 = arith.index_cast %406 : i32 to index
    %c32_246 = arith.constant 32 : index
    %431 = vector.load %arg5[%430, %c32_246] : memref<64x64xf32, #tpu.memory_space<vmem>>, vector<8x32xf32>
    tpu.vector_store %arg5[%430, %c32_246], %427 {strides = array<i32>} : memref<64x64xf32, #tpu.memory_space<vmem>>, vector<8x32xf32>,
    %c5_i32_247 = arith.constant 5 : i32
    %c2_i32_248 = arith.constant 2 : i32
    %432 = arith.muli %c2_i32_248, %c5_i32_247 : i32
    %c7_i32_249 = arith.constant 7 : i32
    %433 = arith.subi %c7_i32_249, %432 : i32
    %c1_i32_250 = arith.constant 1 : i32
    %434 = arith.muli %c1_i32_250, %433 : i32
    %435 = arith.addi %c5_i32_247, %434 : i32
    %c8_i32_251 = arith.constant 8 : i32
    %436 = arith.muli %435, %c8_i32_251 : i32
    %437 = tpu.assume_multiple %436, 8 : i32
    %438 = arith.index_cast %437 : i32 to index
    %c0_252 = arith.constant 0 : index
    %439 = vector.load %arg6[%438, %c0_252] : memref<64x128xf32, #tpu.memory_space<vmem>>, vector<8x128xf32>
    %c0_253 = arith.constant 0 : index
    %c0_254 = arith.constant 0 : index
    %440 = vector.load %arg7[%c0_253, %c0_254] : memref<8x32xf32, #tpu.memory_space<vmem>>, vector<8x32xf32>
    %cst_255 = arith.constant dense<0.000000e+00> : vector<8x128xf32>
    %441 = tpu.matmul %440, %276, %cst_255 {dimension_numbers = #tpu.dot_dimension_numbers<[1], [0], [0], [1], [0, 0, 1, 1], [], []>} : vector<8x32xf32>, vector<32x128xf32>, vector<8x128xf32> -> vector<8x128xf32>
    %442 = arith.addf %439, %441 : vector<8x128xf32>
    %443 = arith.negf %442 : vector<8x128xf32>
    %444 = math.exp %443 : vector<8x128xf32>
    %cst_256 = arith.constant 1.000000e+00 : f32
    %445 = vector.broadcast %cst_256 : f32 to vector<8x128xf32>
    %446 = arith.addf %445, %444 : vector<8x128xf32>
    %447 = arith.divf %445, %446 : vector<8x128xf32>
    %448 = math.tanh %442 : vector<8x128xf32>
    %449 = vector.extract_strided_slice %447 {offsets = [0, 0], sizes = [8, 32], strides = [1, 1]} : vector<8x128xf32> to vector<8x32xf32>
    %450 = vector.extract_strided_slice %447 {offsets = [0, 32], sizes = [8, 32], strides = [1, 1]} : vector<8x128xf32> to vector<8x32xf32>
    %451 = vector.extract_strided_slice %448 {offsets = [0, 64], sizes = [8, 32], strides = [1, 1]} : vector<8x128xf32> to vector<8x32xf32>
    %452 = vector.extract_strided_slice %447 {offsets = [0, 96], sizes = [8, 32], strides = [1, 1]} : vector<8x128xf32> to vector<8x32xf32>
    %c0_257 = arith.constant 0 : index
    %c0_258 = arith.constant 0 : index
    %453 = vector.load %arg8[%c0_257, %c0_258] : memref<8x32xf32, #tpu.memory_space<vmem>>, vector<8x32xf32>
    %454 = arith.mulf %450, %453 : vector<8x32xf32>
    %455 = arith.mulf %449, %451 : vector<8x32xf32>
    %456 = arith.addf %454, %455 : vector<8x32xf32>
    %457 = math.tanh %456 : vector<8x32xf32>
    %458 = arith.mulf %452, %457 : vector<8x32xf32>
    %c0_259 = arith.constant 0 : index
    %c0_260 = arith.constant 0 : index
    %459 = vector.load %arg8[%c0_259, %c0_260] : memref<8x32xf32, #tpu.memory_space<vmem>>, vector<8x32xf32>
    tpu.vector_store %arg8[%c0_259, %c0_260], %456 {strides = array<i32>} : memref<8x32xf32, #tpu.memory_space<vmem>>, vector<8x32xf32>,
    %c0_261 = arith.constant 0 : index
    %c0_262 = arith.constant 0 : index
    %460 = vector.load %arg7[%c0_261, %c0_262] : memref<8x32xf32, #tpu.memory_space<vmem>>, vector<8x32xf32>
    tpu.vector_store %arg7[%c0_261, %c0_262], %458 {strides = array<i32>} : memref<8x32xf32, #tpu.memory_space<vmem>>, vector<8x32xf32>,
    %461 = arith.index_cast %437 : i32 to index
    %c32_263 = arith.constant 32 : index
    %462 = vector.load %arg5[%461, %c32_263] : memref<64x64xf32, #tpu.memory_space<vmem>>, vector<8x32xf32>
    tpu.vector_store %arg5[%461, %c32_263], %458 {strides = array<i32>} : memref<64x64xf32, #tpu.memory_space<vmem>>, vector<8x32xf32>,
    %c6_i32_264 = arith.constant 6 : i32
    %c2_i32_265 = arith.constant 2 : i32
    %463 = arith.muli %c2_i32_265, %c6_i32_264 : i32
    %c7_i32_266 = arith.constant 7 : i32
    %464 = arith.subi %c7_i32_266, %463 : i32
    %c1_i32_267 = arith.constant 1 : i32
    %465 = arith.muli %c1_i32_267, %464 : i32
    %466 = arith.addi %c6_i32_264, %465 : i32
    %c8_i32_268 = arith.constant 8 : i32
    %467 = arith.muli %466, %c8_i32_268 : i32
    %468 = tpu.assume_multiple %467, 8 : i32
    %469 = arith.index_cast %468 : i32 to index
    %c0_269 = arith.constant 0 : index
    %470 = vector.load %arg6[%469, %c0_269] : memref<64x128xf32, #tpu.memory_space<vmem>>, vector<8x128xf32>
    %c0_270 = arith.constant 0 : index
    %c0_271 = arith.constant 0 : index
    %471 = vector.load %arg7[%c0_270, %c0_271] : memref<8x32xf32, #tpu.memory_space<vmem>>, vector<8x32xf32>
    %cst_272 = arith.constant dense<0.000000e+00> : vector<8x128xf32>
    %472 = tpu.matmul %471, %276, %cst_272 {dimension_numbers = #tpu.dot_dimension_numbers<[1], [0], [0], [1], [0, 0, 1, 1], [], []>} : vector<8x32xf32>, vector<32x128xf32>, vector<8x128xf32> -> vector<8x128xf32>
    %473 = arith.addf %470, %472 : vector<8x128xf32>
    %474 = arith.negf %473 : vector<8x128xf32>
    %475 = math.exp %474 : vector<8x128xf32>
    %cst_273 = arith.constant 1.000000e+00 : f32
    %476 = vector.broadcast %cst_273 : f32 to vector<8x128xf32>
    %477 = arith.addf %476, %475 : vector<8x128xf32>
    %478 = arith.divf %476, %477 : vector<8x128xf32>
    %479 = math.tanh %473 : vector<8x128xf32>
    %480 = vector.extract_strided_slice %478 {offsets = [0, 0], sizes = [8, 32], strides = [1, 1]} : vector<8x128xf32> to vector<8x32xf32>
    %481 = vector.extract_strided_slice %478 {offsets = [0, 32], sizes = [8, 32], strides = [1, 1]} : vector<8x128xf32> to vector<8x32xf32>
    %482 = vector.extract_strided_slice %479 {offsets = [0, 64], sizes = [8, 32], strides = [1, 1]} : vector<8x128xf32> to vector<8x32xf32>
    %483 = vector.extract_strided_slice %478 {offsets = [0, 96], sizes = [8, 32], strides = [1, 1]} : vector<8x128xf32> to vector<8x32xf32>
    %c0_274 = arith.constant 0 : index
    %c0_275 = arith.constant 0 : index
    %484 = vector.load %arg8[%c0_274, %c0_275] : memref<8x32xf32, #tpu.memory_space<vmem>>, vector<8x32xf32>
    %485 = arith.mulf %481, %484 : vector<8x32xf32>
    %486 = arith.mulf %480, %482 : vector<8x32xf32>
    %487 = arith.addf %485, %486 : vector<8x32xf32>
    %488 = math.tanh %487 : vector<8x32xf32>
    %489 = arith.mulf %483, %488 : vector<8x32xf32>
    %c0_276 = arith.constant 0 : index
    %c0_277 = arith.constant 0 : index
    %490 = vector.load %arg8[%c0_276, %c0_277] : memref<8x32xf32, #tpu.memory_space<vmem>>, vector<8x32xf32>
    tpu.vector_store %arg8[%c0_276, %c0_277], %487 {strides = array<i32>} : memref<8x32xf32, #tpu.memory_space<vmem>>, vector<8x32xf32>,
    %c0_278 = arith.constant 0 : index
    %c0_279 = arith.constant 0 : index
    %491 = vector.load %arg7[%c0_278, %c0_279] : memref<8x32xf32, #tpu.memory_space<vmem>>, vector<8x32xf32>
    tpu.vector_store %arg7[%c0_278, %c0_279], %489 {strides = array<i32>} : memref<8x32xf32, #tpu.memory_space<vmem>>, vector<8x32xf32>,
    %492 = arith.index_cast %468 : i32 to index
    %c32_280 = arith.constant 32 : index
    %493 = vector.load %arg5[%492, %c32_280] : memref<64x64xf32, #tpu.memory_space<vmem>>, vector<8x32xf32>
    tpu.vector_store %arg5[%492, %c32_280], %489 {strides = array<i32>} : memref<64x64xf32, #tpu.memory_space<vmem>>, vector<8x32xf32>,
    %c7_i32_281 = arith.constant 7 : i32
    %c2_i32_282 = arith.constant 2 : i32
    %494 = arith.muli %c2_i32_282, %c7_i32_281 : i32
    %c7_i32_283 = arith.constant 7 : i32
    %495 = arith.subi %c7_i32_283, %494 : i32
    %c1_i32_284 = arith.constant 1 : i32
    %496 = arith.muli %c1_i32_284, %495 : i32
    %497 = arith.addi %c7_i32_281, %496 : i32
    %c8_i32_285 = arith.constant 8 : i32
    %498 = arith.muli %497, %c8_i32_285 : i32
    %499 = tpu.assume_multiple %498, 8 : i32
    %500 = arith.index_cast %499 : i32 to index
    %c0_286 = arith.constant 0 : index
    %501 = vector.load %arg6[%500, %c0_286] : memref<64x128xf32, #tpu.memory_space<vmem>>, vector<8x128xf32>
    %c0_287 = arith.constant 0 : index
    %c0_288 = arith.constant 0 : index
    %502 = vector.load %arg7[%c0_287, %c0_288] : memref<8x32xf32, #tpu.memory_space<vmem>>, vector<8x32xf32>
    %cst_289 = arith.constant dense<0.000000e+00> : vector<8x128xf32>
    %503 = tpu.matmul %502, %276, %cst_289 {dimension_numbers = #tpu.dot_dimension_numbers<[1], [0], [0], [1], [0, 0, 1, 1], [], []>} : vector<8x32xf32>, vector<32x128xf32>, vector<8x128xf32> -> vector<8x128xf32>
    %504 = arith.addf %501, %503 : vector<8x128xf32>
    %505 = arith.negf %504 : vector<8x128xf32>
    %506 = math.exp %505 : vector<8x128xf32>
    %cst_290 = arith.constant 1.000000e+00 : f32
    %507 = vector.broadcast %cst_290 : f32 to vector<8x128xf32>
    %508 = arith.addf %507, %506 : vector<8x128xf32>
    %509 = arith.divf %507, %508 : vector<8x128xf32>
    %510 = math.tanh %504 : vector<8x128xf32>
    %511 = vector.extract_strided_slice %509 {offsets = [0, 0], sizes = [8, 32], strides = [1, 1]} : vector<8x128xf32> to vector<8x32xf32>
    %512 = vector.extract_strided_slice %509 {offsets = [0, 32], sizes = [8, 32], strides = [1, 1]} : vector<8x128xf32> to vector<8x32xf32>
    %513 = vector.extract_strided_slice %510 {offsets = [0, 64], sizes = [8, 32], strides = [1, 1]} : vector<8x128xf32> to vector<8x32xf32>
    %514 = vector.extract_strided_slice %509 {offsets = [0, 96], sizes = [8, 32], strides = [1, 1]} : vector<8x128xf32> to vector<8x32xf32>
    %c0_291 = arith.constant 0 : index
    %c0_292 = arith.constant 0 : index
    %515 = vector.load %arg8[%c0_291, %c0_292] : memref<8x32xf32, #tpu.memory_space<vmem>>, vector<8x32xf32>
    %516 = arith.mulf %512, %515 : vector<8x32xf32>
    %517 = arith.mulf %511, %513 : vector<8x32xf32>
    %518 = arith.addf %516, %517 : vector<8x32xf32>
    %519 = math.tanh %518 : vector<8x32xf32>
    %520 = arith.mulf %514, %519 : vector<8x32xf32>
    %c0_293 = arith.constant 0 : index
    %c0_294 = arith.constant 0 : index
    %521 = vector.load %arg8[%c0_293, %c0_294] : memref<8x32xf32, #tpu.memory_space<vmem>>, vector<8x32xf32>
    tpu.vector_store %arg8[%c0_293, %c0_294], %518 {strides = array<i32>} : memref<8x32xf32, #tpu.memory_space<vmem>>, vector<8x32xf32>,
    %c0_295 = arith.constant 0 : index
    %c0_296 = arith.constant 0 : index
    %522 = vector.load %arg7[%c0_295, %c0_296] : memref<8x32xf32, #tpu.memory_space<vmem>>, vector<8x32xf32>
    tpu.vector_store %arg7[%c0_295, %c0_296], %520 {strides = array<i32>} : memref<8x32xf32, #tpu.memory_space<vmem>>, vector<8x32xf32>,
    %523 = arith.index_cast %499 : i32 to index
    %c32_297 = arith.constant 32 : index
    %524 = vector.load %arg5[%523, %c32_297] : memref<64x64xf32, #tpu.memory_space<vmem>>, vector<8x32xf32>
    tpu.vector_store %arg5[%523, %c32_297], %520 {strides = array<i32>} : memref<64x64xf32, #tpu.memory_space<vmem>>, vector<8x32xf32>,
    %c8_i32_298 = arith.constant 8 : i32
    return
  }
  func.func @transform_0(%arg0: i32) -> (i32, i32) {
    %c0_i32 = arith.constant 0 : i32
    %c0_i32_0 = arith.constant 0 : i32
    %c0_i32_1 = arith.constant 0 : i32
    return %c0_i32, %c0_i32_0 : i32, i32
  }
  func.func @transform_1(%arg0: i32) -> (i32, i32, i32) {
    %c0_i32 = arith.constant 0 : i32
    %c0_i32_0 = arith.constant 0 : i32
    %c0_i32_1 = arith.constant 0 : i32
    %c0_i32_2 = arith.constant 0 : i32
    return %c0_i32, %c0_i32_0, %c0_i32_1 : i32, i32, i32
  }
  func.func @transform_2(%arg0: i32) -> (i32, i32, i32) {
    %c0_i32 = arith.constant 0 : i32
    %c0_i32_0 = arith.constant 0 : i32
    %c0_i32_1 = arith.constant 0 : i32
    %c0_i32_2 = arith.constant 0 : i32
    return %c0_i32, %c0_i32_0, %c0_i32_1 : i32, i32, i32
  }
  func.func @transform_3(%arg0: i32) -> (i32, i32, i32) {
    %c0_i32 = arith.constant 0 : i32
    %c0_i32_0 = arith.constant 0 : i32
    %c0_i32_1 = arith.constant 0 : i32
    %c0_i32_2 = arith.constant 0 : i32
    return %c0_i32, %c0_i32_0, %c0_i32_1 : i32, i32, i32
  }
  func.func @transform_4(%arg0: i32) -> (i32, i32) {
    %c0_i32 = arith.constant 0 : i32
    %c0_i32_0 = arith.constant 0 : i32
    %c0_i32_1 = arith.constant 0 : i32
    return %c0_i32, %c0_i32_0 : i32, i32
  }
}

</mosaic_0001>

<bundles_post_ra>
// kernel: tpu_custom_call.1
= control target key start
LH: loop header
LB: loop body
LE: loop exit
PB: predicated region body
PF: predicated region fallthrough
CT: control target
= control target key end

     0   :  { %9 = vsyncpa [#allocation6], 0  ;;  %s2209_s0 = inlined_call_operand.vmem [shape: f32[64,16], index: 0, kind: input, shape index: {}]   ;;  %s2210_s1 = inlined_call_operand.hbm [shape: f32[2,16,128], index: 1, kind: input, shape index: {}]   ;;  %s2211_s2 = inlined_call_operand.vmem [shape: f32[2,32,128], index: 2, kind: input, shape index: {}]   ;;  %s2212_s3 = inlined_call_operand.vmem [shape: f32[2,1,128], index: 3, kind: input, shape index: {}]   ;;  %s2213_s4 = inlined_call_operand.hbm [shape: f32[64,64], index: 4, kind: output, shape index: {}]  }
   0x1   :  { %10 = vsyncpa [#allocation7], 0  ;;  %s17_s17 = sshll.u32 %s2210_s1, 4  ;;  %s1758_s18 = smov [#allocation5]   ;;  %s18_s17 = int_to_ptr.hbm [resolvable:$true] %s17_s17 }
   0x2   :  { %s19_s19 = sshll.u32 %s1758_s18, 4  ;;  %s1759_s20 = smov 128   ;;  %s20_s19 = int_to_ptr.vmem [resolvable:$true] %s19_s19 }
   0x3   :  { %s1760_s21 = smov 8  }
   0x4   :  { %25 = dma.hbm_to_vmem [thread:$0]  %s18_s17, 512, %s20_s19, [#allocation6], %s1759_s20, %s1759_s20, %s1760_s21  }
   0x5   :  { %1754 = dma.done.wait [#allocation6], 512  }
   0x6   :  { %1755 = vsyncadd [#allocation6], 4294966784  ;;  %vm122_vm0 = vcmask 261120   ;;  %v1761_v0 = vmov 0.0   ;;  %v1804_v1 = vld [vmem:[%s2211_s2 + $0x18] sm:$0xff]  ;;  %v1809_v3 = vld [vmem:[%s2211_s2 + $0x10] sm:$0xff] }
   0x7   :  { %123 = vst.msk [vmem:[#allocation3] sm:$0xff] %vm122_vm0, %v1761_v0  ;;  %v43_v2 = vld [vmem:[#allocation5 + $0x8] sm:$0xff]  ;;  %146 = vmatpush.msra.mxu1 %v1804_v1  ;;  %v42_v4 = vld [vmem:[#allocation5] sm:$0xff]  ;;  %v1815_v5 = vld [vmem:[%s2209_s0] sm:$0xff]  ;;  %vm48_vm1 = vcmask 130048   ;;  %226 = vmatpush.msra.mxu2 %v1804_v1  ;;  %s1762_s7 = smov 64  }
   0x8   :  { %124 = vst.msk [vmem:[#allocation4] sm:$0xff] %vm122_vm0, %v1761_v0  ;;  %87 = vmatpush.msra.mxu0 %v43_v2  ;;  %v1820_v6 = vld [vmem:[%s2211_s2 + $0x8] sm:$0xff]  ;;  %v1829_v7 = vld [vmem:[%s2211_s2] sm:$0xff]  ;;  %s1763_s8 = smov 32   ;;  %s1764_s9 = smov 96  }
   0x9   :  { %147 = vmatpush.msra.mxu1 %v1809_v3  ;;  %227 = vmatpush.msra.mxu2 %v1809_v3  ;;  %v1852_v9 = vld [vmem:[%s2212_s3] ss:$0 sm:$0xff]  ;;  %v1864_v38 = vld [vmem:[%s2209_s0 + $0x8] sm:$0xff] }
   0xa   :  { %88 = vmatpush.msra.mxu0 %v42_v4 }
   0xb   :  { %1515 = vmatmul.msk.f32.vlgmr.msra.gmra.mxu0 %vm48_vm1, %v1815_v5  ;;  %148 = vmatpush.msra.mxu1 %v1820_v6 }
   0xc   :  { %228 = vmatpush.msra.mxu2 %v1820_v6 }
   0xd   :  { %149 = vmatpush.msra.mxu1 %v1829_v7 }
   0xe   :  { %v130_v8 = vld [vmem:[#allocation3] sm:$0xff]  ;;  %229 = vmatpush.msra.mxu2 %v1829_v7 }
   0xf   :  { %1523 = vmatmul.msk.f32.vlgmr.msra.gmra.mxu1 %vm122_vm0, %v130_v8  ;;  %v175_v15 = vld [vmem:[#allocation4] sm:$0xff] }
  0x10   :  { %307 = vmatpush.msrb.mxu1 %v1804_v1  ;;  %469 = vmatpush.msrb.mxu2 %v1804_v1 }
  0x12   :  { %308 = vmatpush.msrb.mxu1 %v1809_v3  ;;  %470 = vmatpush.msrb.mxu2 %v1809_v3 }
  0x13   :  { %1516 = vmatmul.msk.f32.gmra.mxu0 %vm48_vm1, %v1864_v38 }
  0x14   :  { %309 = vmatpush.msrb.mxu1 %v1820_v6  ;;  %471 = vmatpush.msrb.mxu2 %v1820_v6 }
  0x16   :  { %310 = vmatpush.msrb.mxu1 %v1829_v7  ;;  %472 = vmatpush.msrb.mxu2 %v1829_v7 }
  0x18   :  { %388 = vmatpush.msra.mxu1 %v1804_v1 }
  0x1a   :  { %389 = vmatpush.msra.mxu1 %v1809_v3 }
  0x1c   :  { %390 = vmatpush.msra.mxu1 %v1820_v6 }
  0x1e   :  { %391 = vmatpush.msra.mxu1 %v1829_v7 }
  0x88   :  { %v90_v10 = vpop.f32.mrf.mxu0 }
  0x89   :  { %v91_v11 = vadd.f32 %v1852_v9, %v90_v10 }
  0x8c   :  { %v151_v12 = vpop.f32.mrf.mxu1 }
  0x8d   :  { %v154_v13 = vadd.f32 %v151_v12, %v91_v11 }
  0x8f   :  { %1578 = vtanh.f32 %v154_v13  ;;  %v1524_v16 = vmul.f32 -1.442695, %v154_v13 }
  0x90   :  { %v93_v43 = vpop.f32.mrf.mxu0 }
  0x91   :  { %1580 = vpow2.f32 %v1524_v16  ;;  %v94_v44 = vadd.f32 %v1852_v9, %v93_v43 }
  0x95   :  { %v1579_v14 = vpop.eup %1578 }
  0x96   :  { %182 = vrot.lane.b32.xlu0 %v1579_v14, %s1762_s7 }
  0x97   :  { %v1581_v17 = vpop.eup %1580 }
  0x98   :  { %v158_v18 = vadd.f32 1.0, %v1581_v17 }
  0x9a   :  { %1582 = vrcp.f32 %v158_v18  ;;  %v170_v24 = vand.u32 2147483648, %v158_v18  ;;  %vm164_vm3 = vweird.f32 %v158_v18  ;;  %v168_v25 = vand.u32 2147483647, %v158_v18 }
  0x9c   :  { %v171_v27 = vor.u32 1.1754944e-38, %v170_v24  ;;  %vm169_vm5 = vcmp.eq.f32.partialorder %v168_v25, 8.507059e+37 }
  0x9e   :  { %177 = vrot.lane.b32.xlu0 %v175_v15, %s1763_s8  ;;  %v1888_v15 = vld [vmem:[%s2209_s0 + $0x10] sm:$0xff] }
  0x9f   :  { %1517 = vmatmul.msk.f32.gmra.mxu0 %vm48_vm1, %v1888_v15 }
  0xa0   :  { %v1583_v19 = vpop.eup %1582 }
  0xa1   :  { %v160_v20 = vmul.f32 %v1583_v19, %v158_v18  ;;  %vm165_vm2 = vweird.f32 %v1583_v19 }
  0xa2   :  { %vm166_vm4 = vmor %vm164_vm3, %vm165_vm2 }
  0xa3   :  { %v161_v21 = vsub.f32 1.0, %v160_v20 }
  0xa5   :  { %v162_v22 = vmul.f32 %v1583_v19, %v161_v21 }
  0xa7   :  { %v163_v23 = vadd.f32 %v1583_v19, %v162_v22 }
  0xa9   :  { %v167_v26 = vsel %vm166_vm4, %v1583_v19, %v163_v23 }
  0xaa   :  { %v172_v29 = vsel %vm169_vm5, %v171_v27, %v167_v26 }
 0x108   :  { %v183_v28 = vpop.permute.xlu0 %182 }
 0x109   :  { %v185_v30 = vmul.f32 %v183_v28, %v172_v29 }
 0x10b   :  { %187 = vrot.lane.b32.xlu1 %v185_v30, %s1763_s8 }
 0x110   :  { %v178_v31 = vpop.permute.xlu0 %177 }
 0x111   :  { %v180_v32 = vmul.f32 %v178_v31, %v172_v29 }
 0x11c   :  { %v96_v18 = vpop.f32.mrf.mxu0 }
 0x11d   :  { %v97_v19 = vadd.f32 %v1852_v9, %v96_v18 }
 0x17d   :  { %v188_v33 = vpop.permute.xlu1 %187 }
 0x17e   :  { %v190_v34 = vadd.f32 %v188_v33, %v180_v32 }
 0x180   :  { %1584 = vtanh.f32 %v190_v34 }
 0x186   :  { %v1585_v35 = vpop.eup %1584 }
 0x187   :  { %193 = vrot.lane.b32.xlu1 %v1585_v35, %s1762_s7 }
 0x1f9   :  { %v194_v36 = vpop.permute.xlu1 %193 }
 0x1fa   :  { %v196_v37 = vmul.f32 %v194_v36, %v172_v29 }
 0x1fc   :  { %203 = vrot.lane.b32.xlu2 %v196_v37, %s1763_s8 }
 0x204   :  { %198 = vrot.lane.b32.xlu2 %v190_v34, %s1764_s9 }
 0x256   :  { %v204_v39 = vpop.permute.xlu2 %203 }
 0x257   :  { %206 = vst.msk [vmem:[#allocation3] sm:$0xff] %vm122_vm0, %v204_v39 }
 0x258   :  { %207 = vst.msk [vmem:[#allocation8] sm:$0xff] %vm122_vm0, %v204_v39 }
 0x25e   :  { %v199_v40 = vpop.permute.xlu2 %198  ;;  %v210_v41 = vld [vmem:[#allocation3] sm:$0xff] }
 0x25f   :  { %201 = vst.msk [vmem:[#allocation4] sm:$0xff] %vm122_vm0, %v199_v40  ;;  %1525 = vmatmul.msk.f32.vlgmr.msra.gmra.mxu2 %vm122_vm0, %v210_v41 }
 0x260   :  { %550 = vmatpush.msra.mxu2 %v1804_v1 }
 0x262   :  { %551 = vmatpush.msra.mxu2 %v1809_v3 }
 0x264   :  { %552 = vmatpush.msra.mxu2 %v1820_v6 }
 0x266   :  { %v255_v42 = vld [vmem:[#allocation4] sm:$0xff]  ;;  %553 = vmatpush.msra.mxu2 %v1829_v7 }
 0x267   :  { %257 = vrot.lane.b32.xlu1 %v255_v42, %s1763_s8 }
 0x2d9   :  { %v258_v63 = vpop.permute.xlu1 %257 }
 0x2e2   :  { %v231_v45 = vpop.f32.mrf.mxu2 }
 0x2e3   :  { %v234_v46 = vadd.f32 %v231_v45, %v94_v44 }
 0x2e5   :  { %1586 = vtanh.f32 %v234_v46  ;;  %v1526_v48 = vmul.f32 -1.442695, %v234_v46 }
 0x2e7   :  { %1588 = vpow2.f32 %v1526_v48  ;;  %v1910_v48 = vld [vmem:[%s2209_s0 + $0x18] sm:$0xff] }
 0x2e8   :  { %1518 = vmatmul.msk.f32.gmra.mxu0 %vm48_vm1, %v1910_v48 }
 0x2eb   :  { %v1587_v47 = vpop.eup %1586 }
 0x2ec   :  { %262 = vrot.lane.b32.xlu0 %v1587_v47, %s1762_s7 }
 0x2ed   :  { %v1589_v49 = vpop.eup %1588 }
 0x2ee   :  { %v238_v50 = vadd.f32 1.0, %v1589_v49 }
 0x2f0   :  { %1590 = vrcp.f32 %v238_v50  ;;  %v250_v56 = vand.u32 2147483648, %v238_v50  ;;  %vm244_vm7 = vweird.f32 %v238_v50  ;;  %v248_v57 = vand.u32 2147483647, %v238_v50 }
 0x2f2   :  { %v251_v59 = vor.u32 1.1754944e-38, %v250_v56  ;;  %vm249_vm9 = vcmp.eq.f32.partialorder %v248_v57, 8.507059e+37 }
 0x2f6   :  { %v1591_v51 = vpop.eup %1590 }
 0x2f7   :  { %v240_v52 = vmul.f32 %v1591_v51, %v238_v50  ;;  %vm245_vm6 = vweird.f32 %v1591_v51 }
 0x2f8   :  { %vm246_vm8 = vmor %vm244_vm7, %vm245_vm6 }
 0x2f9   :  { %v241_v53 = vsub.f32 1.0, %v240_v52 }
 0x2fb   :  { %v242_v54 = vmul.f32 %v1591_v51, %v241_v53 }
 0x2fd   :  { %v243_v55 = vadd.f32 %v1591_v51, %v242_v54 }
 0x2ff   :  { %v247_v58 = vsel %vm246_vm8, %v1591_v51, %v243_v55 }
 0x300   :  { %v252_v61 = vsel %vm249_vm9, %v251_v59, %v247_v58 }
 0x301   :  { %v260_v2 = vmul.f32 %v258_v63, %v252_v61 }
 0x35e   :  { %v263_v60 = vpop.permute.xlu0 %262 }
 0x35f   :  { %v265_v62 = vmul.f32 %v263_v60, %v252_v61 }
 0x361   :  { %267 = vrot.lane.b32.xlu2 %v265_v62, %s1763_s8 }
 0x365   :  { %v99_v51 = vpop.f32.mrf.mxu0 }
 0x366   :  { %v100_v52 = vadd.f32 %v1852_v9, %v99_v51 }
 0x3bb   :  { %v268_v4 = vpop.permute.xlu2 %267 }
 0x3bc   :  { %v270_v8 = vadd.f32 %v268_v4, %v260_v2 }
 0x3be   :  { %1592 = vtanh.f32 %v270_v8  ;;  %278 = vrot.lane.b32.xlu2 %v270_v8, %s1764_s9 }
 0x3c4   :  { %v1593_v10 = vpop.eup %1592 }
 0x3c5   :  { %273 = vrot.lane.b32.xlu0 %v1593_v10, %s1762_s7 }
 0x418   :  { %v279_v11 = vpop.permute.xlu2 %278 }
 0x419   :  { %281 = vst.msk [vmem:[#allocation4] sm:$0xff] %vm122_vm0, %v279_v11 }
 0x420   :  { %v336_v14 = vld [vmem:[#allocation4] sm:$0xff] }
 0x437   :  { %v274_v12 = vpop.permute.xlu0 %273 }
 0x438   :  { %v276_v13 = vmul.f32 %v274_v12, %v252_v61 }
 0x43a   :  { %283 = vrot.lane.b32.xlu1 %v276_v13, %s1763_s8 }
 0x442   :  { %338 = vrot.lane.b32.xlu1 %v336_v14, %s1763_s8 }
 0x4ac   :  { %v284_v16 = vpop.permute.xlu1 %283 }
 0x4ad   :  { %286 = vst.msk [vmem:[#allocation3] sm:$0xff] %vm122_vm0, %v284_v16 }
 0x4ae   :  { %288 = vst.msk [vmem:[#allocation8 + $0x8] sm:$0xff] %vm122_vm0, %v284_v16 }
 0x4b4   :  { %v291_v17 = vld [vmem:[#allocation3] sm:$0xff]  ;;  %v339_v39 = vpop.permute.xlu1 %338 }
 0x4b5   :  { %1527 = vmatmul.msk.f32.vlgmr.msrb.gmra.mxu1 %vm122_vm0, %v291_v17 }
 0x4b6   :  { %631 = vmatpush.msrb.mxu1 %v1804_v1 }
 0x4b8   :  { %632 = vmatpush.msrb.mxu1 %v1809_v3 }
 0x4ba   :  { %633 = vmatpush.msrb.mxu1 %v1820_v6 }
 0x4bc   :  { %634 = vmatpush.msrb.mxu1 %v1829_v7 }
 0x532   :  { %v312_v20 = vpop.f32.mrf.mxu1 }
 0x533   :  { %v315_v21 = vadd.f32 %v312_v20, %v97_v19 }
 0x535   :  { %1594 = vtanh.f32 %v315_v21  ;;  %v1528_v23 = vmul.f32 -1.442695, %v315_v21 }
 0x537   :  { %1596 = vpow2.f32 %v1528_v23 }
 0x53b   :  { %v1595_v22 = vpop.eup %1594 }
 0x53c   :  { %343 = vrot.lane.b32.xlu0 %v1595_v22, %s1762_s7 }
 0x53d   :  { %v1597_v24 = vpop.eup %1596 }
 0x53e   :  { %v319_v25 = vadd.f32 1.0, %v1597_v24  ;;  %v1928_v24 = vld [vmem:[%s2209_s0 + $0x20] sm:$0xff] }
 0x53f   :  { %1519 = vmatmul.msk.f32.gmra.mxu0 %vm48_vm1, %v1928_v24 }
 0x540   :  { %1598 = vrcp.f32 %v319_v25  ;;  %v331_v31 = vand.u32 2147483648, %v319_v25  ;;  %vm325_vm11 = vweird.f32 %v319_v25  ;;  %v329_v32 = vand.u32 2147483647, %v319_v25 }
 0x542   :  { %v332_v34 = vor.u32 1.1754944e-38, %v331_v31  ;;  %vm330_vm13 = vcmp.eq.f32.partialorder %v329_v32, 8.507059e+37 }
 0x546   :  { %v1599_v26 = vpop.eup %1598 }
 0x547   :  { %v321_v27 = vmul.f32 %v1599_v26, %v319_v25  ;;  %vm326_vm10 = vweird.f32 %v1599_v26 }
 0x548   :  { %vm327_vm12 = vmor %vm325_vm11, %vm326_vm10 }
 0x549   :  { %v322_v28 = vsub.f32 1.0, %v321_v27 }
 0x54b   :  { %v323_v29 = vmul.f32 %v1599_v26, %v322_v28 }
 0x54d   :  { %v324_v30 = vadd.f32 %v1599_v26, %v323_v29 }
 0x54f   :  { %v328_v33 = vsel %vm327_vm12, %v1599_v26, %v324_v30 }
 0x550   :  { %v333_v36 = vsel %vm330_vm13, %v332_v34, %v328_v33 }
 0x551   :  { %v341_v40 = vmul.f32 %v339_v39, %v333_v36 }
 0x5ae   :  { %v344_v35 = vpop.permute.xlu0 %343 }
 0x5af   :  { %v346_v37 = vmul.f32 %v344_v35, %v333_v36 }
 0x5b1   :  { %348 = vrot.lane.b32.xlu2 %v346_v37, %s1763_s8 }
 0x5bc   :  { %v102_v27 = vpop.f32.mrf.mxu0 }
 0x5bd   :  { %v103_v28 = vadd.f32 %v1852_v9, %v102_v27 }
 0x60b   :  { %v349_v41 = vpop.permute.xlu2 %348 }
 0x60c   :  { %v351_v42 = vadd.f32 %v349_v41, %v341_v40 }
 0x60e   :  { %1600 = vtanh.f32 %v351_v42  ;;  %359 = vrot.lane.b32.xlu2 %v351_v42, %s1764_s9 }
 0x614   :  { %v1601_v43 = vpop.eup %1600 }
 0x615   :  { %354 = vrot.lane.b32.xlu0 %v1601_v43, %s1762_s7 }
 0x668   :  { %v360_v44 = vpop.permute.xlu2 %359 }
 0x669   :  { %362 = vst.msk [vmem:[#allocation4] sm:$0xff] %vm122_vm0, %v360_v44 }
 0x670   :  { %v417_v47 = vld [vmem:[#allocation4] sm:$0xff] }
 0x687   :  { %v355_v45 = vpop.permute.xlu0 %354 }
 0x688   :  { %v357_v46 = vmul.f32 %v355_v45, %v333_v36 }
 0x68a   :  { %364 = vrot.lane.b32.xlu1 %v357_v46, %s1763_s8 }
 0x692   :  { %419 = vrot.lane.b32.xlu1 %v417_v47, %s1763_s8 }
 0x6fc   :  { %v365_v49 = vpop.permute.xlu1 %364 }
 0x6fd   :  { %367 = vst.msk [vmem:[#allocation3] sm:$0xff] %vm122_vm0, %v365_v49 }
 0x6fe   :  { %369 = vst.msk [vmem:[#allocation8 + $0x10] sm:$0xff] %vm122_vm0, %v365_v49 }
 0x704   :  { %v372_v50 = vld [vmem:[#allocation3] sm:$0xff]  ;;  %v420_v14 = vpop.permute.xlu1 %419 }
 0x705   :  { %1529 = vmatmul.msk.f32.vlgmr.msra.gmra.mxu1 %vm122_vm0, %v372_v50 }
 0x782   :  { %v393_v53 = vpop.f32.mrf.mxu1 }
 0x783   :  { %v396_v54 = vadd.f32 %v393_v53, %v100_v52 }
 0x785   :  { %1602 = vtanh.f32 %v396_v54  ;;  %v1530_v56 = vmul.f32 -1.442695, %v396_v54  ;;  %v1950_v54 = vld [vmem:[%s2209_s0 + $0x28] sm:$0xff] }
 0x786   :  { %1520 = vmatmul.msk.f32.gmra.mxu0 %vm48_vm1, %v1950_v54 }
 0x787   :  { %1604 = vpow2.f32 %v1530_v56 }
 0x78b   :  { %v1603_v55 = vpop.eup %1602 }
 0x78c   :  { %424 = vrot.lane.b32.xlu0 %v1603_v55, %s1762_s7 }
 0x78d   :  { %v1605_v57 = vpop.eup %1604 }
 0x78e   :  { %v400_v58 = vadd.f32 1.0, %v1605_v57 }
 0x790   :  { %1606 = vrcp.f32 %v400_v58  ;;  %v412_v2 = vand.u32 2147483648, %v400_v58  ;;  %vm406_vm15 = vweird.f32 %v400_v58  ;;  %v410_v4 = vand.u32 2147483647, %v400_v58 }
 0x792   :  { %v413_v10 = vor.u32 1.1754944e-38, %v412_v2  ;;  %vm411_vm3 = vcmp.eq.f32.partialorder %v410_v4, 8.507059e+37 }
 0x796   :  { %v1607_v59 = vpop.eup %1606 }
 0x797   :  { %v402_v60 = vmul.f32 %v1607_v59, %v400_v58  ;;  %vm407_vm14 = vweird.f32 %v1607_v59 }
 0x798   :  { %vm408_vm2 = vmor %vm406_vm15, %vm407_vm14 }
 0x799   :  { %v403_v61 = vsub.f32 1.0, %v402_v60 }
 0x79b   :  { %v404_v62 = vmul.f32 %v1607_v59, %v403_v61 }
 0x79d   :  { %v405_v63 = vadd.f32 %v1607_v59, %v404_v62 }
 0x79f   :  { %v409_v8 = vsel %vm408_vm2, %v1607_v59, %v405_v63 }
 0x7a0   :  { %v414_v12 = vsel %vm411_vm3, %v413_v10, %v409_v8 }
 0x7a1   :  { %v422_v16 = vmul.f32 %v420_v14, %v414_v12 }
 0x7fe   :  { %v425_v11 = vpop.permute.xlu0 %424 }
 0x7ff   :  { %v427_v13 = vmul.f32 %v425_v11, %v414_v12 }
 0x801   :  { %429 = vrot.lane.b32.xlu2 %v427_v13, %s1763_s8 }
 0x803   :  { %v105_v57 = vpop.f32.mrf.mxu0 }
 0x804   :  { %v106_v58 = vadd.f32 %v1852_v9, %v105_v57 }
 0x85b   :  { %v430_v17 = vpop.permute.xlu2 %429 }
 0x85c   :  { %v432_v18 = vadd.f32 %v430_v17, %v422_v16 }
 0x85e   :  { %1608 = vtanh.f32 %v432_v18  ;;  %440 = vrot.lane.b32.xlu2 %v432_v18, %s1764_s9 }
 0x864   :  { %v1609_v19 = vpop.eup %1608 }
 0x865   :  { %435 = vrot.lane.b32.xlu0 %v1609_v19, %s1762_s7 }
 0x8b8   :  { %v441_v20 = vpop.permute.xlu2 %440 }
 0x8b9   :  { %443 = vst.msk [vmem:[#allocation4] sm:$0xff] %vm122_vm0, %v441_v20 }
 0x8c0   :  { %v498_v23 = vld [vmem:[#allocation4] sm:$0xff] }
 0x8d7   :  { %v436_v21 = vpop.permute.xlu0 %435 }
 0x8d8   :  { %v438_v22 = vmul.f32 %v436_v21, %v414_v12 }
 0x8da   :  { %445 = vrot.lane.b32.xlu1 %v438_v22, %s1763_s8 }
 0x8e2   :  { %500 = vrot.lane.b32.xlu1 %v498_v23, %s1763_s8 }
 0x94c   :  { %v446_v25 = vpop.permute.xlu1 %445 }
 0x94d   :  { %448 = vst.msk [vmem:[#allocation3] sm:$0xff] %vm122_vm0, %v446_v25 }
 0x94e   :  { %450 = vst.msk [vmem:[#allocation8 + $0x18] sm:$0xff] %vm122_vm0, %v446_v25 }
 0x954   :  { %v453_v26 = vld [vmem:[#allocation3] sm:$0xff]  ;;  %v501_v44 = vpop.permute.xlu1 %500 }
 0x955   :  { %1531 = vmatmul.msk.f32.vlgmr.msrb.gmra.mxu2 %vm122_vm0, %v453_v26 }
 0x956   :  { %712 = vmatpush.msrb.mxu2 %v1804_v1 }
 0x958   :  { %713 = vmatpush.msrb.mxu2 %v1809_v3 }
 0x95a   :  { %714 = vmatpush.msrb.mxu2 %v1820_v6 }
 0x95c   :  { %715 = vmatpush.msrb.mxu2 %v1829_v7 }
 0x9d8   :  { %v474_v29 = vpop.f32.mrf.mxu2 }
 0x9d9   :  { %v477_v30 = vadd.f32 %v474_v29, %v103_v28 }
 0x9db   :  { %1610 = vtanh.f32 %v477_v30  ;;  %v1532_v32 = vmul.f32 -1.442695, %v477_v30 }
 0x9dd   :  { %1612 = vpow2.f32 %v1532_v32 }
 0x9e1   :  { %v1611_v31 = vpop.eup %1610 }
 0x9e2   :  { %505 = vrot.lane.b32.xlu0 %v1611_v31, %s1762_s7  ;;  %v1968_v31 = vld [vmem:[%s2209_s0 + $0x30] sm:$0xff] }
 0x9e3   :  { %v1613_v33 = vpop.eup %1612  ;;  %1521 = vmatmul.msk.f32.gmra.mxu0 %vm48_vm1, %v1968_v31 }
 0x9e4   :  { %v481_v34 = vadd.f32 1.0, %v1613_v33 }
 0x9e6   :  { %1614 = vrcp.f32 %v481_v34  ;;  %v493_v7 = vand.u32 2147483648, %v481_v34  ;;  %vm487_vm5 = vweird.f32 %v481_v34  ;;  %v491_v37 = vand.u32 2147483647, %v481_v34 }
 0x9e8   :  { %v494_v40 = vor.u32 1.1754944e-38, %v493_v7  ;;  %vm492_vm7 = vcmp.eq.f32.partialorder %v491_v37, 8.507059e+37 }
 0x9ec   :  { %v1615_v1 = vpop.eup %1614 }
 0x9ed   :  { %v483_v3 = vmul.f32 %v1615_v1, %v481_v34  ;;  %vm488_vm4 = vweird.f32 %v1615_v1 }
 0x9ee   :  { %vm489_vm6 = vmor %vm487_vm5, %vm488_vm4 }
 0x9ef   :  { %v484_v35 = vsub.f32 1.0, %v483_v3 }
 0x9f1   :  { %v485_v6 = vmul.f32 %v1615_v1, %v484_v35 }
 0x9f3   :  { %v486_v36 = vadd.f32 %v1615_v1, %v485_v6 }
 0x9f5   :  { %v490_v39 = vsel %vm489_vm6, %v1615_v1, %v486_v36 }
 0x9f6   :  { %v495_v42 = vsel %vm492_vm7, %v494_v40, %v490_v39 }
 0x9f7   :  { %v503_v45 = vmul.f32 %v501_v44, %v495_v42 }
 0xa54   :  { %v506_v41 = vpop.permute.xlu0 %505 }
 0xa55   :  { %v508_v43 = vmul.f32 %v506_v41, %v495_v42 }
 0xa57   :  { %510 = vrot.lane.b32.xlu2 %v508_v43, %s1763_s8 }
 0xa60   :  { %v108_v34 = vpop.f32.mrf.mxu0 }
 0xa61   :  { %v109_v1 = vadd.f32 %v1852_v9, %v108_v34 }
 0xab1   :  { %v511_v46 = vpop.permute.xlu2 %510 }
 0xab2   :  { %v513_v47 = vadd.f32 %v511_v46, %v503_v45 }
 0xab4   :  { %1616 = vtanh.f32 %v513_v47  ;;  %521 = vrot.lane.b32.xlu2 %v513_v47, %s1764_s9 }
 0xaba   :  { %v1617_v49 = vpop.eup %1616 }
 0xabb   :  { %516 = vrot.lane.b32.xlu0 %v1617_v49, %s1762_s7 }
 0xb0e   :  { %v522_v50 = vpop.permute.xlu2 %521 }
 0xb0f   :  { %524 = vst.msk [vmem:[#allocation4] sm:$0xff] %vm122_vm0, %v522_v50 }
 0xb16   :  { %v579_v53 = vld [vmem:[#allocation4] sm:$0xff] }
 0xb2d   :  { %v517_v51 = vpop.permute.xlu0 %516 }
 0xb2e   :  { %v519_v52 = vmul.f32 %v517_v51, %v495_v42 }
 0xb30   :  { %526 = vrot.lane.b32.xlu1 %v519_v52, %s1763_s8 }
 0xb38   :  { %581 = vrot.lane.b32.xlu1 %v579_v53, %s1763_s8 }
 0xba2   :  { %v527_v55 = vpop.permute.xlu1 %526 }
 0xba3   :  { %529 = vst.msk [vmem:[#allocation3] sm:$0xff] %vm122_vm0, %v527_v55 }
 0xba4   :  { %531 = vst.msk [vmem:[#allocation8 + $0x20] sm:$0xff] %vm122_vm0, %v527_v55 }
 0xbaa   :  { %v534_v56 = vld [vmem:[#allocation3] sm:$0xff]  ;;  %v582_v21 = vpop.permute.xlu1 %581 }
 0xbab   :  { %1533 = vmatmul.msk.f32.vlgmr.msra.gmra.mxu2 %vm122_vm0, %v534_v56 }
 0xc2e   :  { %v555_v59 = vpop.f32.mrf.mxu2 }
 0xc2f   :  { %v558_v60 = vadd.f32 %v555_v59, %v106_v58 }
 0xc31   :  { %1618 = vtanh.f32 %v558_v60  ;;  %v1534_v62 = vmul.f32 -1.442695, %v558_v60 }
 0xc33   :  { %1620 = vpow2.f32 %v1534_v62  ;;  %v41_v62 = vld [vmem:[%s2209_s0 + $0x38] sm:$0xff] }
 0xc34   :  { %1522 = vmatmul.msk.f32.gmra.mxu0 %vm48_vm1, %v41_v62 }
 0xc37   :  { %v1619_v61 = vpop.eup %1618 }
 0xc38   :  { %586 = vrot.lane.b32.xlu0 %v1619_v61, %s1762_s7 }
 0xc39   :  { %v1621_v63 = vpop.eup %1620 }
 0xc3a   :  { %v562_v2 = vadd.f32 1.0, %v1621_v63 }
 0xc3c   :  { %1622 = vrcp.f32 %v562_v2  ;;  %v574_v13 = vand.u32 2147483648, %v562_v2  ;;  %vm568_vm9 = vweird.f32 %v562_v2  ;;  %v572_v14 = vand.u32 2147483647, %v562_v2 }
 0xc3e   :  { %v575_v17 = vor.u32 1.1754944e-38, %v574_v13  ;;  %vm573_vm11 = vcmp.eq.f32.partialorder %v572_v14, 8.507059e+37 }
 0xc42   :  { %v1623_v4 = vpop.eup %1622 }
 0xc43   :  { %v564_v8 = vmul.f32 %v1623_v4, %v562_v2  ;;  %vm569_vm8 = vweird.f32 %v1623_v4 }
 0xc44   :  { %vm570_vm10 = vmor %vm568_vm9, %vm569_vm8 }
 0xc45   :  { %v565_v10 = vsub.f32 1.0, %v564_v8 }
 0xc47   :  { %v566_v11 = vmul.f32 %v1623_v4, %v565_v10 }
 0xc49   :  { %v567_v12 = vadd.f32 %v1623_v4, %v566_v11 }
 0xc4b   :  { %v571_v16 = vsel %vm570_vm10, %v1623_v4, %v567_v12 }
 0xc4c   :  { %v576_v19 = vsel %vm573_vm11, %v575_v17, %v571_v16 }
 0xc4d   :  { %v584_v22 = vmul.f32 %v582_v21, %v576_v19 }
 0xcaa   :  { %v587_v18 = vpop.permute.xlu0 %586 }
 0xcab   :  { %v589_v20 = vmul.f32 %v587_v18, %v576_v19 }
 0xcad   :  { %591 = vrot.lane.b32.xlu2 %v589_v20, %s1763_s8 }
 0xcb1   :  { %v111_v4 = vpop.f32.mrf.mxu0 }
 0xcb2   :  { %v112_v8 = vadd.f32 %v1852_v9, %v111_v4 }
 0xd07   :  { %v592_v23 = vpop.permute.xlu2 %591 }
 0xd08   :  { %v594_v25 = vadd.f32 %v592_v23, %v584_v22 }
 0xd0a   :  { %1624 = vtanh.f32 %v594_v25  ;;  %602 = vrot.lane.b32.xlu2 %v594_v25, %s1764_s9 }
 0xd10   :  { %v1625_v26 = vpop.eup %1624 }
 0xd11   :  { %597 = vrot.lane.b32.xlu0 %v1625_v26, %s1762_s7 }
 0xd64   :  { %v603_v27 = vpop.permute.xlu2 %602 }
 0xd65   :  { %605 = vst.msk [vmem:[#allocation4] sm:$0xff] %vm122_vm0, %v603_v27 }
 0xd6c   :  { %v660_v30 = vld [vmem:[#allocation4] sm:$0xff] }
 0xd83   :  { %v598_v28 = vpop.permute.xlu0 %597 }
 0xd84   :  { %v600_v29 = vmul.f32 %v598_v28, %v576_v19 }
 0xd86   :  { %607 = vrot.lane.b32.xlu1 %v600_v29, %s1763_s8 }
 0xd8e   :  { %662 = vrot.lane.b32.xlu1 %v660_v30, %s1763_s8 }
 0xdf8   :  { %v608_v32 = vpop.permute.xlu1 %607 }
 0xdf9   :  { %610 = vst.msk [vmem:[#allocation3] sm:$0xff] %vm122_vm0, %v608_v32 }
 0xdfa   :  { %612 = vst.msk [vmem:[#allocation8 + $0x28] sm:$0xff] %vm122_vm0, %v608_v32 }
 0xe00   :  { %v615_v33 = vld [vmem:[#allocation3] sm:$0xff]  ;;  %v663_v52 = vpop.permute.xlu1 %662 }
 0xe01   :  { %1535 = vmatmul.msk.f32.vlgmr.msrb.gmra.mxu1 %vm122_vm0, %v615_v33 }
 0xe7e   :  { %v636_v3 = vpop.f32.mrf.mxu1 }
 0xe7f   :  { %v639_v35 = vadd.f32 %v636_v3, %v109_v1  ;;  %v777_v3 = vld [vmem:[#allocation5 + $0x18] sm:$0xff] }
 0xe80   :  { %797 = vmatpush.msra.mxu3 %v777_v3 }
 0xe81   :  { %1626 = vtanh.f32 %v639_v35  ;;  %v1536_v36 = vmul.f32 -1.442695, %v639_v35  ;;  %v776_v35 = vld [vmem:[#allocation5 + $0x10] sm:$0xff] }
 0xe82   :  { %798 = vmatpush.msra.mxu3 %v776_v35 }
 0xe83   :  { %1628 = vpow2.f32 %v1536_v36  ;;  %1540 = vmatmul.msk.f32.vlgmr.msra.gmra.mxu3 %vm48_vm1, %v1815_v5  ;;  %v2017_v5 = vld [vmem:[%s2211_s2 + $0x38] sm:$0xff] }
 0xe84   :  { %856 = vmatpush.msra.mxu1 %v2017_v5  ;;  %939 = vmatpush.msra.mxu2 %v2017_v5 }
 0xe87   :  { %v1627_v6 = vpop.eup %1626 }
 0xe88   :  { %667 = vrot.lane.b32.xlu0 %v1627_v6, %s1762_s7 }
 0xe89   :  { %v1629_v7 = vpop.eup %1628 }
 0xe8a   :  { %v643_v37 = vadd.f32 1.0, %v1629_v7 }
 0xe8b   :  { %1541 = vmatmul.msk.f32.gmra.mxu3 %vm48_vm1, %v1864_v38  ;;  %v2022_v38 = vld [vmem:[%s2211_s2 + $0x30] sm:$0xff] }
 0xe8c   :  { %1630 = vrcp.f32 %v643_v37  ;;  %v655_v44 = vand.u32 2147483648, %v643_v37  ;;  %vm649_vm13 = vweird.f32 %v643_v37  ;;  %v653_v45 = vand.u32 2147483647, %v643_v37  ;;  %857 = vmatpush.msra.mxu1 %v2022_v38  ;;  %940 = vmatpush.msra.mxu2 %v2022_v38 }
 0xe8e   :  { %v656_v47 = vor.u32 1.1754944e-38, %v655_v44  ;;  %vm654_vm15 = vcmp.eq.f32.partialorder %v653_v45, 8.507059e+37 }
 0xe92   :  { %v1631_v39 = vpop.eup %1630 }
 0xe93   :  { %v645_v40 = vmul.f32 %v1631_v39, %v643_v37  ;;  %vm650_vm12 = vweird.f32 %v1631_v39  ;;  %1542 = vmatmul.msk.f32.gmra.mxu3 %vm48_vm1, %v1888_v15  ;;  %v2029_v15 = vld [vmem:[%s2211_s2 + $0x28] sm:$0xff] }
 0xe94   :  { %vm651_vm14 = vmor %vm649_vm13, %vm650_vm12  ;;  %858 = vmatpush.msra.mxu1 %v2029_v15  ;;  %941 = vmatpush.msra.mxu2 %v2029_v15 }
 0xe95   :  { %v646_v41 = vsub.f32 1.0, %v645_v40 }
 0xe97   :  { %v647_v42 = vmul.f32 %v1631_v39, %v646_v41 }
 0xe99   :  { %v648_v43 = vadd.f32 %v1631_v39, %v647_v42 }
 0xe9b   :  { %v652_v46 = vsel %vm651_vm14, %v1631_v39, %v648_v43  ;;  %1543 = vmatmul.msk.f32.gmra.mxu3 %vm48_vm1, %v1910_v48  ;;  %v2036_v48 = vld [vmem:[%s2211_s2 + $0x20] sm:$0xff] }
 0xe9c   :  { %v657_v50 = vsel %vm654_vm15, %v656_v47, %v652_v46  ;;  %859 = vmatpush.msra.mxu1 %v2036_v48  ;;  %942 = vmatpush.msra.mxu2 %v2036_v48 }
 0xe9d   :  { %v665_v53 = vmul.f32 %v663_v52, %v657_v50 }
 0xe9e   :  { %1021 = vmatpush.msrb.mxu1 %v2017_v5 }
 0xea0   :  { %1022 = vmatpush.msrb.mxu1 %v2022_v38 }
 0xea2   :  { %1023 = vmatpush.msrb.mxu1 %v2029_v15 }
 0xea3   :  { %1544 = vmatmul.msk.f32.gmra.mxu3 %vm48_vm1, %v1928_v24 }
 0xea4   :  { %1024 = vmatpush.msrb.mxu1 %v2036_v48 }
 0xeab   :  { %1545 = vmatmul.msk.f32.gmra.mxu3 %vm48_vm1, %v1950_v54  ;;  %v1577_v54 = vld [vmem:[%s2212_s3 + $0x1] ss:$0 sm:$0xff]  ;;  %s1765_s3 = smov [#allocation8]  }
 0xeac   :  { %s1500_s10 = sshll.u32 %s1765_s3, 4  ;;  %s1501_s10 = int_to_ptr.vmem [resolvable:$true] %s1500_s10 }
 0xeb3   :  { %1546 = vmatmul.msk.f32.gmra.mxu3 %vm48_vm1, %v1968_v31 }
 0xebb   :  { %1547 = vmatmul.msk.f32.gmra.mxu3 %vm48_vm1, %v41_v62 }
 0xefa   :  { %v668_v49 = vpop.permute.xlu0 %667 }
 0xefb   :  { %v670_v51 = vmul.f32 %v668_v49, %v657_v50 }
 0xefd   :  { %672 = vrot.lane.b32.xlu2 %v670_v51, %s1763_s8 }
 0xf06   :  { %v800_v31 = vpop.f32.mrf.mxu3 }
 0xf07   :  { %v2054_v7 = vadd.f32 %v1577_v54, %v800_v31 }
 0xf0e   :  { %v803_v37 = vpop.f32.mrf.mxu3 }
 0xf0f   :  { %v2056_v39 = vadd.f32 %v1577_v54, %v803_v37 }
 0xf16   :  { %v806_v41 = vpop.f32.mrf.mxu3 }
 0xf17   :  { %v2062_v42 = vadd.f32 %v1577_v54, %v806_v41 }
 0xf1e   :  { %v809_v44 = vpop.f32.mrf.mxu3 }
 0xf1f   :  { %v2066_v45 = vadd.f32 %v1577_v54, %v809_v44 }
 0xf26   :  { %v812_v46 = vpop.f32.mrf.mxu3 }
 0xf27   :  { %v2071_v47 = vadd.f32 %v1577_v54, %v812_v46 }
 0xf57   :  { %v673_v55 = vpop.permute.xlu2 %672 }
 0xf58   :  { %v675_v56 = vadd.f32 %v673_v55, %v665_v53 }
 0xf5a   :  { %1632 = vtanh.f32 %v675_v56  ;;  %683 = vrot.lane.b32.xlu2 %v675_v56, %s1764_s9 }
 0xf60   :  { %v1633_v57 = vpop.eup %1632 }
 0xf61   :  { %678 = vrot.lane.b32.xlu0 %v1633_v57, %s1762_s7 }
 0xfb4   :  { %v684_v58 = vpop.permute.xlu2 %683 }
 0xfb5   :  { %686 = vst.msk [vmem:[#allocation4] sm:$0xff] %vm122_vm0, %v684_v58 }
 0xfbc   :  { %v741_v61 = vld [vmem:[#allocation4] sm:$0xff] }
 0xfd3   :  { %v679_v59 = vpop.permute.xlu0 %678 }
 0xfd4   :  { %v681_v60 = vmul.f32 %v679_v59, %v657_v50 }
 0xfd6   :  { %688 = vrot.lane.b32.xlu1 %v681_v60, %s1763_s8 }
 0xfde   :  { %743 = vrot.lane.b32.xlu1 %v741_v61, %s1763_s8 }
0x1048   :  { %v689_v63 = vpop.permute.xlu1 %688 }
0x1049   :  { %691 = vst.msk [vmem:[#allocation3] sm:$0xff] %vm122_vm0, %v689_v63 }
0x104a   :  { %693 = vst.msk [vmem:[#allocation8 + $0x30] sm:$0xff] %vm122_vm0, %v689_v63 }
0x1050   :  { %v696_v2 = vld [vmem:[#allocation3] sm:$0xff]  ;;  %v744_v29 = vpop.permute.xlu1 %743 }
0x1051   :  { %1537 = vmatmul.msk.f32.vlgmr.msrb.gmra.mxu2 %vm122_vm0, %v696_v2 }
0x1052   :  { %1103 = vmatpush.msrb.mxu2 %v2017_v5 }
0x1054   :  { %1104 = vmatpush.msrb.mxu2 %v2022_v38 }
0x1056   :  { %1105 = vmatpush.msrb.mxu2 %v2029_v15 }
0x1058   :  { %1106 = vmatpush.msrb.mxu2 %v2036_v48 }
0x10d4   :  { %v717_v10 = vpop.f32.mrf.mxu2 }
0x10d5   :  { %v720_v11 = vadd.f32 %v717_v10, %v112_v8 }
0x10d7   :  { %1634 = vtanh.f32 %v720_v11  ;;  %v1538_v13 = vmul.f32 -1.442695, %v720_v11 }
0x10d9   :  { %1636 = vpow2.f32 %v1538_v13 }
0x10dd   :  { %v1635_v12 = vpop.eup %1634 }
0x10de   :  { %748 = vrot.lane.b32.xlu0 %v1635_v12, %s1762_s7 }
0x10df   :  { %v1637_v14 = vpop.eup %1636 }
0x10e0   :  { %v724_v16 = vadd.f32 1.0, %v1637_v14 }
0x10e2   :  { %1638 = vrcp.f32 %v724_v16  ;;  %v736_v22 = vand.u32 2147483648, %v724_v16  ;;  %vm730_vm3 = vweird.f32 %v724_v16  ;;  %v734_v9 = vand.u32 2147483647, %v724_v16 }
0x10e4   :  { %v737_v25 = vor.u32 1.1754944e-38, %v736_v22  ;;  %vm735_vm5 = vcmp.eq.f32.partialorder %v734_v9, 8.507059e+37 }
0x10e8   :  { %v1639_v17 = vpop.eup %1638 }
0x10e9   :  { %v726_v18 = vmul.f32 %v1639_v17, %v724_v16  ;;  %vm731_vm2 = vweird.f32 %v1639_v17 }
0x10ea   :  { %vm732_vm4 = vmor %vm730_vm3, %vm731_vm2 }
0x10eb   :  { %v727_v19 = vsub.f32 1.0, %v726_v18 }
0x10ed   :  { %v728_v20 = vmul.f32 %v1639_v17, %v727_v19 }
0x10ef   :  { %v729_v21 = vadd.f32 %v1639_v17, %v728_v20 }
0x10f1   :  { %v733_v23 = vsel %vm732_vm4, %v1639_v17, %v729_v21 }
0x10f2   :  { %v738_v27 = vsel %vm735_vm5, %v737_v25, %v733_v23 }
0x10f3   :  { %v746_v30 = vmul.f32 %v744_v29, %v738_v27 }
0x1150   :  { %v749_v26 = vpop.permute.xlu0 %748 }
0x1151   :  { %v751_v28 = vmul.f32 %v749_v26, %v738_v27 }
0x1153   :  { %753 = vrot.lane.b32.xlu2 %v751_v28, %s1763_s8 }
0x11ad   :  { %v754_v32 = vpop.permute.xlu2 %753 }
0x11ae   :  { %v756_v33 = vadd.f32 %v754_v32, %v746_v30 }
0x11b0   :  { %1640 = vtanh.f32 %v756_v33  ;;  %764 = vrot.lane.b32.xlu2 %v756_v33, %s1764_s9 }
0x11b6   :  { %v1641_v34 = vpop.eup %1640 }
0x11b7   :  { %759 = vrot.lane.b32.xlu0 %v1641_v34, %s1762_s7 }
0x120a   :  { %v765_v1 = vpop.permute.xlu2 %764 }
0x120b   :  { %767 = vst.msk [vmem:[#allocation4] sm:$0xff] %vm122_vm0, %v765_v1 }
0x120c   :  { %833 = vst.msk [vmem:[#allocation4] sm:$0xff] %vm122_vm0, %v1761_v0 }
0x1213   :  { %v885_v24 = vld [vmem:[#allocation4] sm:$0xff] }
0x1229   :  { %v760_v6 = vpop.permute.xlu0 %759 }
0x122a   :  { %v762_v36 = vmul.f32 %v760_v6, %v738_v27 }
0x122c   :  { %769 = vrot.lane.b32.xlu1 %v762_v36, %s1763_s8 }
0x1234   :  { %887 = vrot.lane.b32.xlu1 %v885_v24, %s1763_s8 }
0x129e   :  { %v770_v40 = vpop.permute.xlu1 %769 }
0x129f   :  { %772 = vst.msk [vmem:[#allocation3] sm:$0xff] %vm122_vm0, %v770_v40 }
0x12a0   :  { %774 = vst.msk [vmem:[#allocation8 + $0x38] sm:$0xff] %vm122_vm0, %v770_v40 }
0x12a1   :  { %832 = vst.msk [vmem:[#allocation3] sm:$0xff] %vm122_vm0, %v1761_v0  ;;  %v815_v0 = vpop.f32.mrf.mxu3 }
0x12a2   :  { %v2073_v49 = vadd.f32 %v1577_v54, %v815_v0 }
0x12a6   :  { %v888_v17 = vpop.permute.xlu1 %887 }
0x12a8   :  { %v840_v43 = vld [vmem:[#allocation3] sm:$0xff] }
0x12a9   :  { %1552 = vmatmul.msk.f32.vlgmr.msra.gmra.mxu1 %vm122_vm0, %v840_v43  ;;  %v818_v50 = vpop.f32.mrf.mxu3 }
0x12aa   :  { %1185 = vmatpush.msra.mxu1 %v2017_v5  ;;  %v819_v51 = vadd.f32 %v1577_v54, %v818_v50 }
0x12ac   :  { %1186 = vmatpush.msra.mxu1 %v2022_v38 }
0x12ae   :  { %1187 = vmatpush.msra.mxu1 %v2029_v15 }
0x12b0   :  { %1188 = vmatpush.msra.mxu1 %v2036_v48 }
0x12b1   :  { %v821_v52 = vpop.f32.mrf.mxu3 }
0x12b2   :  { %v822_v53 = vadd.f32 %v1577_v54, %v821_v52 }
0x1326   :  { %v861_v55 = vpop.f32.mrf.mxu1 }
0x1327   :  { %v864_v56 = vadd.f32 %v861_v55, %v822_v53 }
0x1329   :  { %1642 = vtanh.f32 %v864_v56  ;;  %v1553_v58 = vmul.f32 -1.442695, %v864_v56 }
0x132b   :  { %1644 = vpow2.f32 %v1553_v58 }
0x132f   :  { %v1643_v57 = vpop.eup %1642 }
0x1330   :  { %892 = vrot.lane.b32.xlu0 %v1643_v57, %s1762_s7 }
0x1331   :  { %v1645_v59 = vpop.eup %1644 }
0x1332   :  { %v868_v60 = vadd.f32 1.0, %v1645_v59 }
0x1334   :  { %1646 = vrcp.f32 %v868_v60  ;;  %v880_v8 = vand.u32 2147483648, %v868_v60  ;;  %vm874_vm6 = vweird.f32 %v868_v60  ;;  %v878_v10 = vand.u32 2147483647, %v868_v60 }
0x1336   :  { %v881_v12 = vor.u32 1.1754944e-38, %v880_v8  ;;  %vm879_vm8 = vcmp.eq.f32.partialorder %v878_v10, 8.507059e+37 }
0x133a   :  { %v1647_v61 = vpop.eup %1646 }
0x133b   :  { %v870_v62 = vmul.f32 %v1647_v61, %v868_v60  ;;  %vm875_vm1 = vweird.f32 %v1647_v61 }
0x133c   :  { %vm876_vm7 = vmor %vm874_vm6, %vm875_vm1 }
0x133d   :  { %v871_v63 = vsub.f32 1.0, %v870_v62 }
0x133f   :  { %v872_v2 = vmul.f32 %v1647_v61, %v871_v63 }
0x1341   :  { %v873_v4 = vadd.f32 %v1647_v61, %v872_v2 }
0x1343   :  { %v877_v11 = vsel %vm876_vm7, %v1647_v61, %v873_v4 }
0x1344   :  { %v882_v13 = vsel %vm879_vm8, %v881_v12, %v877_v11 }
0x1345   :  { %v890_v18 = vmul.f32 %v888_v17, %v882_v13 }
0x13a2   :  { %v893_v14 = vpop.permute.xlu0 %892 }
0x13a3   :  { %v895_v16 = vmul.f32 %v893_v14, %v882_v13 }
0x13a5   :  { %897 = vrot.lane.b32.xlu2 %v895_v16, %s1763_s8 }
0x13ff   :  { %v898_v19 = vpop.permute.xlu2 %897 }
0x1400   :  { %v900_v20 = vadd.f32 %v898_v19, %v890_v18 }
0x1402   :  { %1648 = vtanh.f32 %v900_v20  ;;  %908 = vrot.lane.b32.xlu2 %v900_v20, %s1764_s9 }
0x1408   :  { %v1649_v21 = vpop.eup %1648 }
0x1409   :  { %903 = vrot.lane.b32.xlu0 %v1649_v21, %s1762_s7 }
0x145c   :  { %v909_v22 = vpop.permute.xlu2 %908 }
0x145d   :  { %911 = vst.msk [vmem:[#allocation4] sm:$0xff] %vm122_vm0, %v909_v22 }
0x1464   :  { %v968_v25 = vld [vmem:[#allocation4] sm:$0xff] }
0x147b   :  { %v904_v9 = vpop.permute.xlu0 %903 }
0x147c   :  { %v2080_v23 = vmul.f32 %v904_v9, %v882_v13 }
0x147e   :  { %913 = vrot.lane.b32.xlu1 %v2080_v23, %s1763_s8 }
0x1486   :  { %970 = vrot.lane.b32.xlu1 %v968_v25, %s1763_s8 }
0x14f0   :  { %v914_v26 = vpop.permute.xlu1 %913 }
0x14f1   :  { %916 = vst.msk [vmem:[#allocation3] sm:$0xff] %vm122_vm0, %v914_v26 }
0x14f8   :  { %v923_v27 = vld [vmem:[#allocation3] sm:$0xff]  ;;  %v971_v44 = vpop.permute.xlu1 %970 }
0x14f9   :  { %1554 = vmatmul.msk.f32.vlgmr.msra.gmra.mxu2 %vm122_vm0, %v923_v27 }
0x14fa   :  { %1267 = vmatpush.msra.mxu2 %v2017_v5 }
0x14fc   :  { %1268 = vmatpush.msra.mxu2 %v2022_v38 }
0x14fe   :  { %1269 = vmatpush.msra.mxu2 %v2029_v15 }
0x1500   :  { %1270 = vmatpush.msra.mxu2 %v2036_v48 }
0x157c   :  { %v944_v28 = vpop.f32.mrf.mxu2 }
0x157d   :  { %v947_v29 = vadd.f32 %v944_v28, %v819_v51 }
0x157f   :  { %1650 = vtanh.f32 %v947_v29  ;;  %v1555_v32 = vmul.f32 -1.442695, %v947_v29 }
0x1581   :  { %1652 = vpow2.f32 %v1555_v32 }
0x1585   :  { %v1651_v30 = vpop.eup %1650 }
0x1586   :  { %975 = vrot.lane.b32.xlu0 %v1651_v30, %s1762_s7 }
0x1587   :  { %v1653_v33 = vpop.eup %1652 }
0x1588   :  { %v951_v34 = vadd.f32 1.0, %v1653_v33 }
0x158a   :  { %1654 = vrcp.f32 %v951_v34  ;;  %v963_v24 = vand.u32 2147483648, %v951_v34  ;;  %vm957_vm10 = vweird.f32 %v951_v34  ;;  %v961_v54 = vand.u32 2147483647, %v951_v34 }
0x158c   :  { %v964_v37 = vor.u32 1.1754944e-38, %v963_v24  ;;  %vm962_vm12 = vcmp.eq.f32.partialorder %v961_v54, 8.507059e+37 }
0x1590   :  { %v1655_v1 = vpop.eup %1654 }
0x1591   :  { %v953_v3 = vmul.f32 %v1655_v1, %v951_v34  ;;  %vm958_vm9 = vweird.f32 %v1655_v1 }
0x1592   :  { %vm959_vm11 = vmor %vm957_vm10, %vm958_vm9 }
0x1593   :  { %v954_v35 = vsub.f32 1.0, %v953_v3 }
0x1595   :  { %v955_v6 = vmul.f32 %v1655_v1, %v954_v35 }
0x1597   :  { %v956_v36 = vadd.f32 %v1655_v1, %v955_v6 }
0x1599   :  { %v960_v31 = vsel %vm959_vm11, %v1655_v1, %v956_v36 }
0x159a   :  { %v965_v41 = vsel %vm962_vm12, %v964_v37, %v960_v31 }
0x159b   :  { %v973_v46 = vmul.f32 %v971_v44, %v965_v41 }
0x15f8   :  { %v976_v40 = vpop.permute.xlu0 %975 }
0x15f9   :  { %v978_v43 = vmul.f32 %v976_v40, %v965_v41 }
0x15fb   :  { %980 = vrot.lane.b32.xlu2 %v978_v43, %s1763_s8 }
0x1655   :  { %v981_v0 = vpop.permute.xlu2 %980 }
0x1656   :  { %v983_v50 = vadd.f32 %v981_v0, %v973_v46 }
0x1658   :  { %1656 = vtanh.f32 %v983_v50  ;;  %991 = vrot.lane.b32.xlu2 %v983_v50, %s1764_s9 }
0x165e   :  { %v1657_v51 = vpop.eup %1656 }
0x165f   :  { %986 = vrot.lane.b32.xlu0 %v1657_v51, %s1762_s7 }
0x16b2   :  { %v992_v52 = vpop.permute.xlu2 %991 }
0x16b3   :  { %994 = vst.msk [vmem:[#allocation4] sm:$0xff] %vm122_vm0, %v992_v52 }
0x16ba   :  { %v1050_v56 = vld [vmem:[#allocation4] sm:$0xff] }
0x16d1   :  { %v987_v53 = vpop.permute.xlu0 %986 }
0x16d2   :  { %v2096_v55 = vmul.f32 %v987_v53, %v965_v41 }
0x16d4   :  { %996 = vrot.lane.b32.xlu1 %v2096_v55, %s1763_s8 }
0x16dc   :  { %1052 = vrot.lane.b32.xlu1 %v1050_v56, %s1763_s8 }
0x1746   :  { %v997_v57 = vpop.permute.xlu1 %996 }
0x1747   :  { %999 = vst.msk [vmem:[#allocation3] sm:$0xff] %vm122_vm0, %v997_v57 }
0x174e   :  { %v1005_v58 = vld [vmem:[#allocation3] sm:$0xff]  ;;  %v1053_v20 = vpop.permute.xlu1 %1052 }
0x174f   :  { %1556 = vmatmul.msk.f32.vlgmr.msrb.gmra.mxu1 %vm122_vm0, %v1005_v58 }
0x1750   :  { %1349 = vmatpush.msrb.mxu1 %v2017_v5 }
0x1752   :  { %1350 = vmatpush.msrb.mxu1 %v2022_v38 }
0x1754   :  { %1351 = vmatpush.msrb.mxu1 %v2029_v15 }
0x1756   :  { %1352 = vmatpush.msrb.mxu1 %v2036_v48 }
0x17cc   :  { %v1026_v59 = vpop.f32.mrf.mxu1 }
0x17cd   :  { %v1029_v60 = vadd.f32 %v1026_v59, %v2073_v49 }
0x17cf   :  { %1658 = vtanh.f32 %v1029_v60  ;;  %v1557_v62 = vmul.f32 -1.442695, %v1029_v60 }
0x17d1   :  { %1660 = vpow2.f32 %v1557_v62 }
0x17d5   :  { %v1659_v61 = vpop.eup %1658 }
0x17d6   :  { %1057 = vrot.lane.b32.xlu0 %v1659_v61, %s1762_s7 }
0x17d7   :  { %v1661_v63 = vpop.eup %1660 }
0x17d8   :  { %v1033_v2 = vadd.f32 1.0, %v1661_v63 }
0x17da   :  { %1662 = vrcp.f32 %v1033_v2  ;;  %v1045_v13 = vand.u32 2147483648, %v1033_v2  ;;  %vm1039_vm14 = vweird.f32 %v1033_v2  ;;  %v1043_v14 = vand.u32 2147483647, %v1033_v2 }
0x17dc   :  { %v1046_v16 = vor.u32 1.1754944e-38, %v1045_v13  ;;  %vm1044_vm2 = vcmp.eq.f32.partialorder %v1043_v14, 8.507059e+37 }
0x17e0   :  { %v1663_v4 = vpop.eup %1662 }
0x17e1   :  { %v1035_v8 = vmul.f32 %v1663_v4, %v1033_v2  ;;  %vm1040_vm13 = vweird.f32 %v1663_v4 }
0x17e2   :  { %vm1041_vm15 = vmor %vm1039_vm14, %vm1040_vm13 }
0x17e3   :  { %v1036_v10 = vsub.f32 1.0, %v1035_v8 }
0x17e5   :  { %v1037_v11 = vmul.f32 %v1663_v4, %v1036_v10 }
0x17e7   :  { %v1038_v12 = vadd.f32 %v1663_v4, %v1037_v11 }
0x17e9   :  { %v1042_v49 = vsel %vm1041_vm15, %v1663_v4, %v1038_v12 }
0x17ea   :  { %v1047_v18 = vsel %vm1044_vm2, %v1046_v16, %v1042_v49 }
0x17eb   :  { %v1055_v21 = vmul.f32 %v1053_v20, %v1047_v18 }
0x1848   :  { %v1058_v17 = vpop.permute.xlu0 %1057 }
0x1849   :  { %v1060_v19 = vmul.f32 %v1058_v17, %v1047_v18 }
0x184b   :  { %1062 = vrot.lane.b32.xlu2 %v1060_v19, %s1763_s8 }
0x18a5   :  { %v1063_v22 = vpop.permute.xlu2 %1062 }
0x18a6   :  { %v1065_v9 = vadd.f32 %v1063_v22, %v1055_v21 }
0x18a8   :  { %1664 = vtanh.f32 %v1065_v9  ;;  %1073 = vrot.lane.b32.xlu2 %v1065_v9, %s1764_s9 }
0x18ae   :  { %v1665_v25 = vpop.eup %1664 }
0x18af   :  { %1068 = vrot.lane.b32.xlu0 %v1665_v25, %s1762_s7 }
0x1902   :  { %v1074_v26 = vpop.permute.xlu2 %1073 }
0x1903   :  { %1076 = vst.msk [vmem:[#allocation4] sm:$0xff] %vm122_vm0, %v1074_v26 }
0x190a   :  { %v1132_v29 = vld [vmem:[#allocation4] sm:$0xff] }
0x1921   :  { %v1069_v27 = vpop.permute.xlu0 %1068 }
0x1922   :  { %v2113_v28 = vmul.f32 %v1069_v27, %v1047_v18 }
0x1924   :  { %1078 = vrot.lane.b32.xlu1 %v2113_v28, %s1763_s8 }
0x192c   :  { %1134 = vrot.lane.b32.xlu1 %v1132_v29, %s1763_s8 }
0x1996   :  { %v1079_v30 = vpop.permute.xlu1 %1078 }
0x1997   :  { %1081 = vst.msk [vmem:[#allocation3] sm:$0xff] %vm122_vm0, %v1079_v30 }
0x199e   :  { %v1087_v32 = vld [vmem:[#allocation3] sm:$0xff]  ;;  %v1135_v43 = vpop.permute.xlu1 %1134 }
0x199f   :  { %1558 = vmatmul.msk.f32.vlgmr.msrb.gmra.mxu2 %vm122_vm0, %v1087_v32 }
0x19a0   :  { %1431 = vmatpush.msrb.mxu2 %v2017_v5 }
0x19a2   :  { %1432 = vmatpush.msrb.mxu2 %v2022_v38 }
0x19a4   :  { %1433 = vmatpush.msrb.mxu2 %v2029_v15 }
0x19a6   :  { %1434 = vmatpush.msrb.mxu2 %v2036_v48 }
0x1a22   :  { %v1108_v33 = vpop.f32.mrf.mxu2 }
0x1a23   :  { %v1111_v34 = vadd.f32 %v1108_v33, %v2071_v47 }
0x1a25   :  { %1666 = vtanh.f32 %v1111_v34  ;;  %v1559_v3 = vmul.f32 -1.442695, %v1111_v34 }
0x1a27   :  { %1668 = vpow2.f32 %v1559_v3 }
0x1a2b   :  { %v1667_v1 = vpop.eup %1666 }
0x1a2c   :  { %1139 = vrot.lane.b32.xlu0 %v1667_v1, %s1762_s7 }
0x1a2d   :  { %v1669_v35 = vpop.eup %1668 }
0x1a2e   :  { %v1115_v6 = vadd.f32 1.0, %v1669_v35 }
0x1a30   :  { %1670 = vrcp.f32 %v1115_v6  ;;  %v1127_v15 = vand.u32 2147483648, %v1115_v6  ;;  %vm1121_vm4 = vweird.f32 %v1115_v6  ;;  %v1125_v48 = vand.u32 2147483647, %v1115_v6 }
0x1a32   :  { %v1128_v31 = vor.u32 1.1754944e-38, %v1127_v15  ;;  %vm1126_vm1 = vcmp.eq.f32.partialorder %v1125_v48, 8.507059e+37 }
0x1a36   :  { %v1671_v36 = vpop.eup %1670 }
0x1a37   :  { %v1117_v5 = vmul.f32 %v1671_v36, %v1115_v6  ;;  %vm1122_vm3 = vweird.f32 %v1671_v36 }
0x1a38   :  { %vm1123_vm5 = vmor %vm1121_vm4, %vm1122_vm3  ;;  %vm920_vm4 = vcmask 523520  }
0x1a39   :  { %v1118_v24 = vsub.f32 1.0, %v1117_v5 }
0x1a3b   :  { %v1119_v38 = vmul.f32 %v1671_v36, %v1118_v24 }
0x1a3d   :  { %v1120_v54 = vadd.f32 %v1671_v36, %v1119_v38 }
0x1a3f   :  { %v1124_v47 = vsel %vm1123_vm5, %v1671_v36, %v1120_v54 }
0x1a40   :  { %v1129_v40 = vsel %vm1126_vm1, %v1128_v31, %v1124_v47 }
0x1a41   :  { %v1137_v44 = vmul.f32 %v1135_v43, %v1129_v40 }
0x1a9e   :  { %v1140_v37 = vpop.permute.xlu0 %1139 }
0x1a9f   :  { %v1142_v41 = vmul.f32 %v1140_v37, %v1129_v40 }
0x1aa1   :  { %1144 = vrot.lane.b32.xlu2 %v1142_v41, %s1763_s8 }
0x1afb   :  { %v1145_v46 = vpop.permute.xlu2 %1144 }
0x1afc   :  { %v1147_v0 = vadd.f32 %v1145_v46, %v1137_v44 }
0x1afe   :  { %1672 = vtanh.f32 %v1147_v0  ;;  %1155 = vrot.lane.b32.xlu2 %v1147_v0, %s1764_s9 }
0x1b04   :  { %v1673_v50 = vpop.eup %1672 }
0x1b05   :  { %1150 = vrot.lane.b32.xlu0 %v1673_v50, %s1762_s7 }
0x1b58   :  { %v1156_v51 = vpop.permute.xlu2 %1155 }
0x1b59   :  { %1158 = vst.msk [vmem:[#allocation4] sm:$0xff] %vm122_vm0, %v1156_v51 }
0x1b60   :  { %v1214_v56 = vld [vmem:[#allocation4] sm:$0xff] }
0x1b77   :  { %v1151_v52 = vpop.permute.xlu0 %1150 }
0x1b78   :  { %v2130_v53 = vmul.f32 %v1151_v52, %v1129_v40 }
0x1b7a   :  { %1160 = vrot.lane.b32.xlu1 %v2130_v53, %s1763_s8 }
0x1b82   :  { %1216 = vrot.lane.b32.xlu1 %v1214_v56, %s1763_s8 }
0x1bec   :  { %v1161_v57 = vpop.permute.xlu1 %1160 }
0x1bed   :  { %1163 = vst.msk [vmem:[#allocation3] sm:$0xff] %vm122_vm0, %v1161_v57 }
0x1bf4   :  { %v1169_v58 = vld [vmem:[#allocation3] sm:$0xff]  ;;  %v1217_v19 = vpop.permute.xlu1 %1216 }
0x1bf5   :  { %1560 = vmatmul.msk.f32.vlgmr.msra.gmra.mxu1 %vm122_vm0, %v1169_v58 }
0x1c72   :  { %v1190_v59 = vpop.f32.mrf.mxu1 }
0x1c73   :  { %v1193_v60 = vadd.f32 %v1190_v59, %v2066_v45 }
0x1c75   :  { %1674 = vtanh.f32 %v1193_v60  ;;  %v1561_v62 = vmul.f32 -1.442695, %v1193_v60 }
0x1c77   :  { %1676 = vpow2.f32 %v1561_v62 }
0x1c7b   :  { %v1675_v61 = vpop.eup %1674 }
0x1c7c   :  { %1221 = vrot.lane.b32.xlu0 %v1675_v61, %s1762_s7 }
0x1c7d   :  { %v1677_v63 = vpop.eup %1676 }
0x1c7e   :  { %v1197_v2 = vadd.f32 1.0, %v1677_v63 }
0x1c80   :  { %1678 = vrcp.f32 %v1197_v2  ;;  %v1209_v13 = vand.u32 2147483648, %v1197_v2  ;;  %vm1203_vm7 = vweird.f32 %v1197_v2  ;;  %v1207_v14 = vand.u32 2147483647, %v1197_v2 }
0x1c82   :  { %v1210_v49 = vor.u32 1.1754944e-38, %v1209_v13  ;;  %vm1208_vm9 = vcmp.eq.f32.partialorder %v1207_v14, 8.507059e+37 }
0x1c86   :  { %v1679_v4 = vpop.eup %1678 }
0x1c87   :  { %v1199_v8 = vmul.f32 %v1679_v4, %v1197_v2  ;;  %vm1204_vm6 = vweird.f32 %v1679_v4 }
0x1c88   :  { %vm1205_vm8 = vmor %vm1203_vm7, %vm1204_vm6 }
0x1c89   :  { %v1200_v10 = vsub.f32 1.0, %v1199_v8 }
0x1c8b   :  { %v1201_v11 = vmul.f32 %v1679_v4, %v1200_v10 }
0x1c8d   :  { %v1202_v12 = vadd.f32 %v1679_v4, %v1201_v11 }
0x1c8f   :  { %v1206_v45 = vsel %vm1205_vm8, %v1679_v4, %v1202_v12 }
0x1c90   :  { %v1211_v17 = vsel %vm1208_vm9, %v1210_v49, %v1206_v45 }
0x1c91   :  { %v1219_v20 = vmul.f32 %v1217_v19, %v1211_v17 }
0x1cee   :  { %v1222_v16 = vpop.permute.xlu0 %1221 }
0x1cef   :  { %v1224_v18 = vmul.f32 %v1222_v16, %v1211_v17 }
0x1cf1   :  { %1226 = vrot.lane.b32.xlu2 %v1224_v18, %s1763_s8 }
0x1d4b   :  { %v1227_v21 = vpop.permute.xlu2 %1226 }
0x1d4c   :  { %v1229_v22 = vadd.f32 %v1227_v21, %v1219_v20 }
0x1d4e   :  { %1680 = vtanh.f32 %v1229_v22  ;;  %1237 = vrot.lane.b32.xlu2 %v1229_v22, %s1764_s9 }
0x1d54   :  { %v1681_v9 = vpop.eup %1680 }
0x1d55   :  { %1232 = vrot.lane.b32.xlu0 %v1681_v9, %s1762_s7 }
0x1da8   :  { %v1238_v25 = vpop.permute.xlu2 %1237 }
0x1da9   :  { %1240 = vst.msk [vmem:[#allocation4] sm:$0xff] %vm122_vm0, %v1238_v25 }
0x1db0   :  { %v1296_v29 = vld [vmem:[#allocation4] sm:$0xff] }
0x1dc7   :  { %v1233_v26 = vpop.permute.xlu0 %1232 }
0x1dc8   :  { %v2143_v27 = vmul.f32 %v1233_v26, %v1211_v17 }
0x1dca   :  { %1242 = vrot.lane.b32.xlu1 %v2143_v27, %s1763_s8 }
0x1dd2   :  { %1298 = vrot.lane.b32.xlu1 %v1296_v29, %s1763_s8 }
0x1e3c   :  { %v1243_v30 = vpop.permute.xlu1 %1242 }
0x1e3d   :  { %1245 = vst.msk [vmem:[#allocation3] sm:$0xff] %vm122_vm0, %v1243_v30 }
0x1e44   :  { %v1251_v32 = vld [vmem:[#allocation3] sm:$0xff]  ;;  %v1299_v41 = vpop.permute.xlu1 %1298 }
0x1e45   :  { %1562 = vmatmul.msk.f32.vlgmr.msra.gmra.mxu2 %vm122_vm0, %v1251_v32 }
0x1ec8   :  { %v1272_v33 = vpop.f32.mrf.mxu2 }
0x1ec9   :  { %v1275_v34 = vadd.f32 %v1272_v33, %v2062_v42 }
0x1ecb   :  { %1682 = vtanh.f32 %v1275_v34  ;;  %v1563_v3 = vmul.f32 -1.442695, %v1275_v34 }
0x1ecd   :  { %1684 = vpow2.f32 %v1563_v3 }
0x1ed1   :  { %v1683_v1 = vpop.eup %1682 }
0x1ed2   :  { %1303 = vrot.lane.b32.xlu0 %v1683_v1, %s1762_s7 }
0x1ed3   :  { %v1685_v35 = vpop.eup %1684 }
0x1ed4   :  { %v1279_v6 = vadd.f32 1.0, %v1685_v35 }
0x1ed6   :  { %1686 = vrcp.f32 %v1279_v6  ;;  %v1291_v15 = vand.u32 2147483648, %v1279_v6  ;;  %vm1285_vm11 = vweird.f32 %v1279_v6  ;;  %v1289_v48 = vand.u32 2147483647, %v1279_v6 }
0x1ed8   :  { %v1292_v47 = vor.u32 1.1754944e-38, %v1291_v15  ;;  %vm1290_vm13 = vcmp.eq.f32.partialorder %v1289_v48, 8.507059e+37 }
0x1edc   :  { %v1687_v36 = vpop.eup %1686 }
0x1edd   :  { %v1281_v5 = vmul.f32 %v1687_v36, %v1279_v6  ;;  %vm1286_vm10 = vweird.f32 %v1687_v36 }
0x1ede   :  { %vm1287_vm12 = vmor %vm1285_vm11, %vm1286_vm10 }
0x1edf   :  { %v1282_v24 = vsub.f32 1.0, %v1281_v5 }
0x1ee1   :  { %v1283_v38 = vmul.f32 %v1687_v36, %v1282_v24 }
0x1ee3   :  { %v1284_v54 = vadd.f32 %v1687_v36, %v1283_v38 }
0x1ee5   :  { %v1288_v42 = vsel %vm1287_vm12, %v1687_v36, %v1284_v54 }
0x1ee6   :  { %v1293_v37 = vsel %vm1290_vm13, %v1292_v47, %v1288_v42 }
0x1ee7   :  { %v1301_v43 = vmul.f32 %v1299_v41, %v1293_v37 }
0x1f44   :  { %v1304_v31 = vpop.permute.xlu0 %1303 }
0x1f45   :  { %v1306_v40 = vmul.f32 %v1304_v31, %v1293_v37 }
0x1f47   :  { %1308 = vrot.lane.b32.xlu2 %v1306_v40, %s1763_s8 }
0x1fa1   :  { %v1309_v44 = vpop.permute.xlu2 %1308 }
0x1fa2   :  { %v1311_v46 = vadd.f32 %v1309_v44, %v1301_v43 }
0x1fa4   :  { %1688 = vtanh.f32 %v1311_v46  ;;  %1319 = vrot.lane.b32.xlu2 %v1311_v46, %s1764_s9 }
0x1faa   :  { %v1689_v0 = vpop.eup %1688 }
0x1fab   :  { %1314 = vrot.lane.b32.xlu0 %v1689_v0, %s1762_s7 }
0x1ffe   :  { %v1320_v50 = vpop.permute.xlu2 %1319 }
0x1fff   :  { %1322 = vst.msk [vmem:[#allocation4] sm:$0xff] %vm122_vm0, %v1320_v50 }
0x2006   :  { %v1378_v56 = vld [vmem:[#allocation4] sm:$0xff] }
0x201d   :  { %v1315_v51 = vpop.permute.xlu0 %1314 }
0x201e   :  { %v2156_v52 = vmul.f32 %v1315_v51, %v1293_v37 }
0x2020   :  { %1324 = vrot.lane.b32.xlu1 %v2156_v52, %s1763_s8 }
0x2028   :  { %1380 = vrot.lane.b32.xlu1 %v1378_v56, %s1763_s8 }
0x2092   :  { %v1325_v57 = vpop.permute.xlu1 %1324 }
0x2093   :  { %1327 = vst.msk [vmem:[#allocation3] sm:$0xff] %vm122_vm0, %v1325_v57 }
0x209a   :  { %v1333_v58 = vld [vmem:[#allocation3] sm:$0xff]  ;;  %v1381_v18 = vpop.permute.xlu1 %1380 }
0x209b   :  { %1564 = vmatmul.msk.f32.vlgmr.msrb.gmra.mxu1 %vm122_vm0, %v1333_v58 }
0x2118   :  { %v1354_v59 = vpop.f32.mrf.mxu1 }
0x2119   :  { %v1357_v60 = vadd.f32 %v1354_v59, %v2056_v39 }
0x211b   :  { %1690 = vtanh.f32 %v1357_v60  ;;  %v1565_v62 = vmul.f32 -1.442695, %v1357_v60 }
0x211d   :  { %1692 = vpow2.f32 %v1565_v62 }
0x2121   :  { %v1691_v61 = vpop.eup %1690 }
0x2122   :  { %1385 = vrot.lane.b32.xlu0 %v1691_v61, %s1762_s7 }
0x2123   :  { %v1693_v63 = vpop.eup %1692 }
0x2124   :  { %v1361_v2 = vadd.f32 1.0, %v1693_v63 }
0x2126   :  { %1694 = vrcp.f32 %v1361_v2  ;;  %v1373_v13 = vand.u32 2147483648, %v1361_v2  ;;  %vm1367_vm15 = vweird.f32 %v1361_v2  ;;  %v1371_v14 = vand.u32 2147483647, %v1361_v2 }
0x2128   :  { %v1374_v45 = vor.u32 1.1754944e-38, %v1373_v13  ;;  %vm1372_vm3 = vcmp.eq.f32.partialorder %v1371_v14, 8.507059e+37 }
0x212c   :  { %v1695_v4 = vpop.eup %1694 }
0x212d   :  { %v1363_v8 = vmul.f32 %v1695_v4, %v1361_v2  ;;  %vm1368_vm14 = vweird.f32 %v1695_v4 }
0x212e   :  { %vm1369_vm2 = vmor %vm1367_vm15, %vm1368_vm14 }
0x212f   :  { %v1364_v10 = vsub.f32 1.0, %v1363_v8 }
0x2131   :  { %v1365_v11 = vmul.f32 %v1695_v4, %v1364_v10 }
0x2133   :  { %v1366_v12 = vadd.f32 %v1695_v4, %v1365_v11 }
0x2135   :  { %v1370_v39 = vsel %vm1369_vm2, %v1695_v4, %v1366_v12 }
0x2136   :  { %v1375_v16 = vsel %vm1372_vm3, %v1374_v45, %v1370_v39 }
0x2137   :  { %v1383_v19 = vmul.f32 %v1381_v18, %v1375_v16 }
0x2194   :  { %v1386_v49 = vpop.permute.xlu0 %1385 }
0x2195   :  { %v1388_v17 = vmul.f32 %v1386_v49, %v1375_v16 }
0x2197   :  { %1390 = vrot.lane.b32.xlu2 %v1388_v17, %s1763_s8 }
0x21f1   :  { %v1391_v20 = vpop.permute.xlu2 %1390 }
0x21f2   :  { %v1393_v21 = vadd.f32 %v1391_v20, %v1383_v19 }
0x21f4   :  { %1696 = vtanh.f32 %v1393_v21  ;;  %1401 = vrot.lane.b32.xlu2 %v1393_v21, %s1764_s9 }
0x21fa   :  { %v1697_v22 = vpop.eup %1696 }
0x21fb   :  { %1396 = vrot.lane.b32.xlu0 %v1697_v22, %s1762_s7 }
0x224e   :  { %v1402_v9 = vpop.permute.xlu2 %1401 }
0x224f   :  { %1404 = vst.msk [vmem:[#allocation4] sm:$0xff] %vm122_vm0, %v1402_v9 }
0x2256   :  { %v1460_v29 = vld [vmem:[#allocation4] sm:$0xff] }
0x226d   :  { %v1397_v25 = vpop.permute.xlu0 %1396 }
0x226e   :  { %v1399_v26 = vmul.f32 %v1397_v25, %v1375_v16 }
0x2270   :  { %1406 = vrot.lane.b32.xlu1 %v1399_v26, %s1763_s8 }
0x2278   :  { %1462 = vrot.lane.b32.xlu1 %v1460_v29, %s1763_s8 }
0x2280   :  { %917 = vrot.lane.b32.xlu1 %v2080_v23, %s1762_s7 }
0x2288   :  { %1164 = vrot.lane.b32.xlu1 %v2130_v53, %s1762_s7 }
0x2290   :  { %1410 = vrot.lane.b32.xlu1 %v1399_v26, %s1762_s7 }
0x22e2   :  { %v1407_v30 = vpop.permute.xlu1 %1406 }
0x22e3   :  { %1409 = vst.msk [vmem:[#allocation3] sm:$0xff] %vm122_vm0, %v1407_v30 }
0x22ea   :  { %v1463_v32 = vpop.permute.xlu1 %1462  ;;  %v1415_v33 = vld [vmem:[#allocation3] sm:$0xff] }
0x22eb   :  { %1566 = vmatmul.msk.f32.vlgmr.msrb.gmra.mxu2 %vm122_vm0, %v1415_v33 }
0x22f2   :  { %v918_v34 = vpop.permute.xlu1 %917 }
0x22f3   :  { %921 = vst.msk [vmem:[#allocation8 + $0x38] sm:$0xff] %vm920_vm4, %v918_v34 }
0x22fa   :  { %v1165_v1 = vpop.permute.xlu1 %1164 }
0x22fb   :  { %1167 = vst.msk [vmem:[#allocation8 + $0x20] sm:$0xff] %vm920_vm4, %v1165_v1 }
0x2302   :  { %v1411_v23 = vpop.permute.xlu1 %1410 }
0x2303   :  { %1413 = vst.msk [vmem:[#allocation8 + $0x8] sm:$0xff] %vm920_vm4, %v1411_v23 }
0x236e   :  { %v1436_v53 = vpop.f32.mrf.mxu2 }
0x236f   :  { %v1439_v3 = vadd.f32 %v1436_v53, %v2054_v7 }
0x2371   :  { %1698 = vtanh.f32 %v1439_v3  ;;  %v1567_v6 = vmul.f32 -1.442695, %v1439_v3 }
0x2373   :  { %1700 = vpow2.f32 %v1567_v6 }
0x2377   :  { %v1699_v35 = vpop.eup %1698 }
0x2378   :  { %1467 = vrot.lane.b32.xlu0 %v1699_v35, %s1762_s7 }
0x2379   :  { %v1701_v36 = vpop.eup %1700 }
0x237a   :  { %v1443_v5 = vadd.f32 1.0, %v1701_v36 }
0x237c   :  { %1702 = vrcp.f32 %v1443_v5  ;;  %v1455_v42 = vand.u32 2147483648, %v1443_v5  ;;  %vm1449_vm1 = vweird.f32 %v1443_v5  ;;  %v1453_v47 = vand.u32 2147483647, %v1443_v5 }
0x237e   :  { %v1456_v31 = vor.u32 1.1754944e-38, %v1455_v42  ;;  %vm1454_vm7 = vcmp.eq.f32.partialorder %v1453_v47, 8.507059e+37 }
0x2382   :  { %v1703_v24 = vpop.eup %1702 }
0x2383   :  { %v1445_v38 = vmul.f32 %v1703_v24, %v1443_v5  ;;  %vm1450_vm5 = vweird.f32 %v1703_v24 }
0x2384   :  { %vm1451_vm6 = vmor %vm1449_vm1, %vm1450_vm5 }
0x2385   :  { %v1446_v54 = vsub.f32 1.0, %v1445_v38 }
0x2387   :  { %v1447_v15 = vmul.f32 %v1703_v24, %v1446_v54 }
0x2389   :  { %v1448_v48 = vadd.f32 %v1703_v24, %v1447_v15 }
0x238b   :  { %v1452_v7 = vsel %vm1451_vm6, %v1703_v24, %v1448_v48 }
0x238c   :  { %v1457_v40 = vsel %vm1454_vm7, %v1456_v31, %v1452_v7 }
0x238d   :  { %v1465_v43 = vmul.f32 %v1463_v32, %v1457_v40 }
0x23ea   :  { %v1468_v37 = vpop.permute.xlu0 %1467 }
0x23eb   :  { %v1470_v41 = vmul.f32 %v1468_v37, %v1457_v40 }
0x23ed   :  { %1472 = vrot.lane.b32.xlu2 %v1470_v41, %s1763_s8 }
0x23f5   :  { %1000 = vrot.lane.b32.xlu2 %v2096_v55, %s1762_s7 }
0x23fd   :  { %1246 = vrot.lane.b32.xlu2 %v2143_v27, %s1762_s7 }
0x2447   :  { %v1473_v44 = vpop.permute.xlu2 %1472 }
0x2448   :  { %v1475_v46 = vadd.f32 %v1473_v44, %v1465_v43 }
0x244a   :  { %1704 = vtanh.f32 %v1475_v46 }
0x244f   :  { %v1001_v0 = vpop.permute.xlu2 %1000 }
0x2450   :  { %v1705_v50 = vpop.eup %1704  ;;  %1003 = vst.msk [vmem:[#allocation8 + $0x30] sm:$0xff] %vm920_vm4, %v1001_v0 }
0x2451   :  { %1478 = vrot.lane.b32.xlu0 %v1705_v50, %s1762_s7 }
0x2457   :  { %v1247_v51 = vpop.permute.xlu2 %1246 }
0x2458   :  { %1249 = vst.msk [vmem:[#allocation8 + $0x18] sm:$0xff] %vm920_vm4, %v1247_v51 }
0x2459   :  { %1082 = vrot.lane.b32.xlu0 %v2113_v28, %s1762_s7 }
0x2461   :  { %1328 = vrot.lane.b32.xlu0 %v2156_v52, %s1762_s7 }
0x2469   :  { %1483 = vrot.lane.b32.xlu0 %v1475_v46, %s1764_s9  ;;  %s1502_s9 = sshll.u32 %s2213_s4, 4  ;;  %s1503_s9 = int_to_ptr.hbm [resolvable:$true] %s1502_s9 }
0x24c3   :  { %v1479_v55 = vpop.permute.xlu0 %1478 }
0x24c4   :  { %v1481_v27 = vmul.f32 %v1479_v55, %v1457_v40 }
0x24c6   :  { %1488 = vrot.lane.b32.xlu1 %v1481_v27, %s1763_s8  ;;  %1492 = vrot.lane.b32.xlu2 %v1481_v27, %s1762_s7 }
0x24cb   :  { %v1083_v56 = vpop.permute.xlu0 %1082 }
0x24cc   :  { %1085 = vst.msk [vmem:[#allocation8 + $0x28] sm:$0xff] %vm920_vm4, %v1083_v56 }
0x24d3   :  { %v1329_v57 = vpop.permute.xlu0 %1328 }
0x24d4   :  { %1331 = vst.msk [vmem:[#allocation8 + $0x10] sm:$0xff] %vm920_vm4, %v1329_v57 }
0x24db   :  { %v1484_v58 = vpop.permute.xlu0 %1483 }
0x24dc   :  { %1486 = vst.msk [vmem:[#allocation4] sm:$0xff] %vm122_vm0, %v1484_v58 }
0x2520   :  { %v1493_v28 = vpop.permute.xlu2 %1492 }
0x2521   :  { %1495 = vst.msk [vmem:[#allocation8] sm:$0xff] %vm920_vm4, %v1493_v28 }
0x2522   :  { %1508 = dma.vmem_to_hbm [thread:$0]  %s1501_s10, 1024, %s1503_s9, [#allocation7], %s1759_s20, %s1759_s20, %s1760_s21  }
0x2538   :  { %v1489_v52 = vpop.permute.xlu1 %1488 }
0x2539   :  { %1491 = vst.msk [vmem:[#allocation3] sm:$0xff] %vm122_vm0, %v1489_v52 }
0x253a   :  { %1756 = dma.done.wait [#allocation7], 1024  }
0x253b   :  { %1757 = vsyncadd [#allocation7], 4294966272 }
0x253c   :  { %1513 = vsyncpa [#allocation6], 1 }
0x253d   :  { %1514 = vsyncpa [#allocation7], 1 }

</bundles_post_ra>
